<compile_context>
chip_gen: v7x
topology: tpu7x:2x2x1
jax: 0.10.0
libtpu: 0.0.40
codegen_flags: <defaults>
</compile_context>

<pallas_src>
import jax
import jax.numpy as jnp
import numpy as np
from jax import lax
from jax.experimental import pallas as pl
from jax.experimental.pallas import tpu as pltpu


# --------------------------------------------------------------------------- #
# Kernels
# --------------------------------------------------------------------------- #
def _fused_kernel(eps, inv_count):
    def kernel(mask0_ref, invdeg_ref, gamma_ref, beta_ref, x_ref, o_ref):
        x = x_ref[...].astype(jnp.float32)            # (B, NC, SP)
        m0 = mask0_ref[...]                           # (1, 1, SP): 1.0 on l=0 lanes
        w = invdeg_ref[...]                           # (1, 1, SP): 1/(2l+1)

        # per-channel statistics over batch + l=0 spatial lanes
        mean = jnp.sum(x * m0, axis=(0, 2), keepdims=True) * inv_count        # (1,NC,1)
        mean_sq = jnp.sum(x * x * w, axis=(0, 2), keepdims=True) * inv_count  # (1,NC,1)
        # Reference uses E[x^2]-E[x]^2 without a clamp; the clamp only matters
        # at ULP level when var ~ 0 and is the numerically safer behavior.
        var = jnp.maximum(mean_sq - mean * mean, 0.0)
        scale = gamma_ref[...] * lax.rsqrt(var + eps)                          # (1,NC,1)
        shift = beta_ref[...] - mean * scale                                   # (1,NC,1)

        # single fused store: l=0 centering + beta handled by the lane mask
        o_ref[...] = (x * scale + m0 * shift).astype(o_ref.dtype)

    return kernel


def _stats_kernel(mask0_ref, invdeg_ref, x_ref, sum0_ref, sumsq_ref):
    @pl.when(pl.program_id(1) == 0)
    def _():
        sum0_ref[...] = jnp.zeros_like(sum0_ref)
        sumsq_ref[...] = jnp.zeros_like(sumsq_ref)

    x = x_ref[...].astype(jnp.float32)                # (B, NC, CH)
    m0 = mask0_ref[...]                               # (1, 1, CH)
    w = invdeg_ref[...]                               # (1, 1, CH)
    # where() (not a plain multiply) so unspecified values in the padded tail
    # of the last lane chunk cannot poison the sums.
    sum0_ref[...] += jnp.sum(jnp.where(m0 > 0, x, 0.0), axis=(0, 2), keepdims=True)
    sumsq_ref[...] += jnp.sum(jnp.where(w > 0, x * x * w, 0.0), axis=(0, 2), keepdims=True)


def _apply_kernel(mask0_ref, scale_ref, shift_ref, x_ref, o_ref):
    x = x_ref[...].astype(jnp.float32)
    o_ref[...] = (x * scale_ref[...] + mask0_ref[...] * shift_ref[...]).astype(o_ref.dtype)


# --------------------------------------------------------------------------- #
# Sizing helpers
# --------------------------------------------------------------------------- #
def _vmem_config():
    """(block-picker budget, compiler vmem_limit_bytes), generation-aware."""
    cap = None
    try:
        cap = getattr(pltpu.get_tpu_info(), "vmem_capacity_bytes", None)
    except Exception:
        cap = None
    if not cap:
        cap = 64 * 1024 * 1024                        # assume smallest per-core VMEM (v7x)
    budget = min(cap * 3 // 8, 56 * 1024 * 1024)      # v5e/v6e ~48 MiB, v7x ~24 MiB
    limit = min(cap * 3 // 4, 96 * 1024 * 1024)       # v5e/v6e 96 MiB, v7x 48 MiB
    return int(budget), int(limit)


def _sublane_quantum(dtype):
    # second-to-last block dim must be a multiple of this (or the full dim)
    return max(8, 32 // jnp.dtype(dtype).itemsize)


def _per_channel_bytes(B, SP, itemsize):
    # 2x double-buffered input + 2x double-buffered output (native dtype)
    # + ~1 f32 block of fused temporaries inside the body (~5x for f32 io).
    return B * SP * (4 * itemsize + 4)


def _pick_single_pass_nc(B, N, SP, itemsize, quantum, budget):
    per_chan = _per_channel_bytes(B, SP, itemsize)
    cands = {N} | set(range(quantum, N + 1, quantum))
    best, best_key = None, None
    for nc in sorted(cands):
        if nc * per_chan > budget:
            continue
        steps = pl.cdiv(N, nc)
        waste = nc * steps - N
        # prefer >=4 grid steps (DMA pipelining + v7x 2-TC sharding), then low
        # channel overshoot, then the biggest block.
        key = (min(steps, 4), -waste, nc)
        if best_key is None or key > best_key:
            best, best_key = nc, key
    return best


def _pick_chunk_params(B, N, SP, itemsize, quantum, budget):
    nc = N if N <= quantum else quantum
    per_elem = 4 * itemsize + 4
    ch = (budget // (B * nc * per_elem)) // 128 * 128
    ch = int(max(128, min(ch, pl.cdiv(SP, 128) * 128)))
    return nc, ch


# --------------------------------------------------------------------------- #
# Wrapper
# --------------------------------------------------------------------------- #
def se3_batch_norm(x, gamma, beta, order, eps=1e-32, *, vmem_budget_bytes=None):
    """Training-mode SE3BatchNorm forward.

    x:     (B, N, S, H, W, D), any float dtype, S = order*(4*order^2-1)//3
    gamma: N elements (any shape), beta: N elements (any shape)
    """
    B, N, S, H, W, D = x.shape
    assert S == order * (4 * order ** 2 - 1) // 3
    P = H * W * D
    SP = S * P
    itemsize = jnp.dtype(x.dtype).itemsize
    quantum = _sublane_quantum(x.dtype)
    budget, vmem_limit = _vmem_config()
    if vmem_budget_bytes is not None:
        budget = vmem_budget_bytes

    inv_count = np.float32(1.0 / (B * P))
    # per-lane weights over the flattened (S*P) axis, built host-side once
    inv_deg = np.repeat(
        np.concatenate([np.full((2 * l + 1) ** 2, 1.0 / (2 * l + 1), np.float32)
                        for l in range(order)]), P)                         # (SP,)
    mask0 = np.zeros((SP,), np.float32)
    mask0[:P] = 1.0                                                          # l=0 lanes

    x_flat = x.reshape(B, N, SP)               # free metadata reshape, native dtype
    gamma_r = jnp.asarray(gamma, jnp.float32).reshape(1, N, 1)
    beta_r = jnp.asarray(beta, jnp.float32).reshape(1, N, 1)

    nc = _pick_single_pass_nc(B, N, SP, itemsize, quantum, budget)

    if nc is not None:
        # ---- single-pass fused path: x read once, out written once -------- #
        grid_c = pl.cdiv(N, nc)
        out = pl.pallas_call(
            _fused_kernel(float(eps), float(inv_count)),
            out_shape=jax.ShapeDtypeStruct((B, N, SP), x.dtype),
            grid_spec=pltpu.PrefetchScalarGridSpec(
                num_scalar_prefetch=0,
                grid=(grid_c,),
                in_specs=[
                    pl.BlockSpec((1, 1, SP), lambda c: (0, 0, 0)),      # l=0 mask
                    pl.BlockSpec((1, 1, SP), lambda c: (0, 0, 0)),      # 1/(2l+1)
                    pl.BlockSpec((1, nc, 1), lambda c: (0, c, 0)),      # gamma
                    pl.BlockSpec((1, nc, 1), lambda c: (0, c, 0)),      # beta
                    pl.BlockSpec((B, nc, SP), lambda c: (0, c, 0)),     # x
                ],
                out_specs=pl.BlockSpec((B, nc, SP), lambda c: (0, c, 0)),
            ),
            compiler_params=pltpu.CompilerParams(
                dimension_semantics=("parallel",),
                vmem_limit_bytes=vmem_limit,
            ),
        )(jnp.asarray(mask0).reshape(1, 1, SP),
          jnp.asarray(inv_deg).reshape(1, 1, SP),
          gamma_r, beta_r, x_flat)
        return out.reshape(B, N, S, H, W, D)

    # ---- chunked two-pass fallback (one channel block does not fit VMEM) -- #
    nc, ch = _pick_chunk_params(B, N, SP, itemsize, quantum, budget)
    grid_c = pl.cdiv(N, nc)
    k_steps = pl.cdiv(SP, ch)
    sp_ceil = k_steps * ch
    mask0_p = np.zeros((sp_ceil,), np.float32)
    mask0_p[:P] = 1.0
    invdeg_p = np.zeros((sp_ceil,), np.float32)
    invdeg_p[:SP] = inv_deg
    mask0_a = jnp.asarray(mask0_p).reshape(1, 1, sp_ceil)
    invdeg_a = jnp.asarray(invdeg_p).reshape(1, 1, sp_ceil)

    sum0, sumsq = pl.pallas_call(
        _stats_kernel,
        out_shape=(jax.ShapeDtypeStruct((1, N, 1), jnp.float32),
                   jax.ShapeDtypeStruct((1, N, 1), jnp.float32)),
        grid_spec=pltpu.PrefetchScalarGridSpec(
            num_scalar_prefetch=0,
            grid=(grid_c, k_steps),
            in_specs=[
                pl.BlockSpec((1, 1, ch), lambda c, k: (0, 0, k)),       # l=0 mask
                pl.BlockSpec((1, 1, ch), lambda c, k: (0, 0, k)),       # 1/(2l+1)
                pl.BlockSpec((B, nc, ch), lambda c, k: (0, c, k)),      # x
            ],
            out_specs=(pl.BlockSpec((1, nc, 1), lambda c, k: (0, c, 0)),
                       pl.BlockSpec((1, nc, 1), lambda c, k: (0, c, 0))),
        ),
        compiler_params=pltpu.CompilerParams(
            dimension_semantics=("parallel", "arbitrary"),
            vmem_limit_bytes=vmem_limit,
        ),
    )(mask0_a, invdeg_a, x_flat)

    mean = sum0 * inv_count
    var = jnp.maximum(sumsq * inv_count - mean * mean, 0.0)
    scale = gamma_r / jnp.sqrt(var + jnp.float32(eps))
    shift = beta_r - mean * scale

    out = pl.pallas_call(
        _apply_kernel,
        out_shape=jax.ShapeDtypeStruct((B, N, SP), x.dtype),
        grid_spec=pltpu.PrefetchScalarGridSpec(
            num_scalar_prefetch=0,
            grid=(grid_c, k_steps),
            in_specs=[
                pl.BlockSpec((1, 1, ch), lambda c, k: (0, 0, k)),       # l=0 mask
                pl.BlockSpec((1, nc, 1), lambda c, k: (0, c, 0)),       # scale
                pl.BlockSpec((1, nc, 1), lambda c, k: (0, c, 0)),       # shift
                pl.BlockSpec((B, nc, ch), lambda c, k: (0, c, k)),      # x
            ],
            out_specs=pl.BlockSpec((B, nc, ch), lambda c, k: (0, c, k)),
        ),
        compiler_params=pltpu.CompilerParams(
            dimension_semantics=("parallel", "parallel"),
            vmem_limit_bytes=vmem_limit,
        ),
    )(mask0_a, scale, shift, x_flat)
    return out.reshape(B, N, S, H, W, D)


# --------------------------------------------------------------------------- #
# Pure-JAX reference (matches the PyTorch forward, training mode)
# --------------------------------------------------------------------------- #
def se3_batch_norm_ref(x, gamma, beta, order, eps=1e-32):
    B, N, S, H, W, D = x.shape
    x = x.astype(jnp.float32)
    mean = x[:, :, :1].mean(axis=(0, 3, 4, 5), keepdims=True)
    degree_mult = jnp.concatenate(
        [jnp.full(((2 * l + 1) ** 2,), float(2 * l + 1), jnp.float32)
         for l in range(order)], axis=0)
    mean_sq = jnp.sum(
        x ** 2 / degree_mult[None, None, :, None, None, None],
        axis=2, keepdims=True).mean(axis=(0, 3, 4, 5), keepdims=True)
    var = mean_sq - mean ** 2
    g = jnp.asarray(gamma, jnp.float32).reshape(1, N, 1, 1, 1, 1)
    b = jnp.asarray(beta, jnp.float32).reshape(1, N, 1, 1, 1, 1)
    beta_ext = jnp.concatenate(
        [b, jnp.zeros((1, N, S - 1, 1, 1, 1), jnp.float32)], axis=2)
    mean_ext = jnp.concatenate(
        [mean, jnp.zeros((1, N, S - 1, 1, 1, 1), jnp.float32)], axis=2)
    return g * (x - mean_ext) / jnp.sqrt(var + eps) + beta_ext


if __name__ == "__main__":
    # Small, module-consistent shapes: order L=2 -> S = 1 + 9 = 10 components.
    B, N, order = 2, 4, 2
    S = order * (4 * order ** 2 - 1) // 3
    H = W = D = 8

    key = jax.random.PRNGKey(0)
    kx, kg, kb = jax.random.split(key, 3)
    x = jax.random.normal(kx, (B, N, S, H, W, D), jnp.float32)
    gamma = 1.0 + 0.1 * jax.random.normal(kg, (N,), jnp.float32)
    beta = 0.1 * jax.random.normal(kb, (N,), jnp.float32)

    ref = se3_batch_norm_ref(x, gamma, beta, order)

    # main single-pass fused path
    out = jax.block_until_ready(se3_batch_norm(x, gamma, beta, order))
    np.testing.assert_allclose(np.asarray(out), np.asarray(ref), rtol=1e-5, atol=2e-5)

    # chunked two-pass fallback (forced with a tiny block budget)
    out_fb = jax.block_until_ready(
        se3_batch_norm(x, gamma, beta, order, vmem_budget_bytes=64 * 1024))
    np.testing.assert_allclose(np.asarray(out_fb), np.asarray(ref), rtol=1e-5, atol=2e-5)

    # bf16 activations: streamed in native dtype, stats in f32 inside the kernel
    xb = x.astype(jnp.bfloat16)
    out_b = jax.block_until_ready(se3_batch_norm(xb, gamma, beta, order))
    ref_b = se3_batch_norm_ref(xb, gamma, beta, order)
    np.testing.assert_allclose(np.asarray(jnp.asarray(out_b, jnp.float32)),
                               np.asarray(ref_b), rtol=3e-2, atol=3e-2)

    print("KERNEL_OK")
</pallas_src>

<mosaic_0001>
module attributes {stable_mosaic.version = 11 : i64} {
  func.func @kernel(%arg0: i32, %arg1: memref<1x1x5120xf32, #tpu.memory_space<vmem>>, %arg2: memref<1x1x5120xf32, #tpu.memory_space<vmem>>, %arg3: memref<1x4x1xf32, #tpu.memory_space<vmem>>, %arg4: memref<1x4x1xf32, #tpu.memory_space<vmem>>, %arg5: memref<2x4x5120xf32, #tpu.memory_space<vmem>>, %arg6: memref<2x4x5120xf32, #tpu.memory_space<vmem>>) attributes {dimension_semantics = [#tpu.dimension_semantics<parallel>], iteration_bounds = array<i64: 1>, scalar_prefetch = 0 : i64, scratch_operands = 0 : i64, tpu.core_type = #tpu.core_type<tc>, window_params = [{pipeline_mode = #tpu.pipeline_mode<synchronous>, transform_indices = @transform_0, window_bounds = array<i64: 1, 1, 5120>}, {pipeline_mode = #tpu.pipeline_mode<synchronous>, transform_indices = @transform_1, window_bounds = array<i64: 1, 1, 5120>}, {transform_indices = @transform_2, window_bounds = array<i64: 1, 4, 1>}, {transform_indices = @transform_3, window_bounds = array<i64: 1, 4, 1>}, {transform_indices = @transform_4, window_bounds = array<i64: 2, 4, 5120>}, {transform_indices = @transform_5, window_bounds = array<i64: 2, 4, 5120>}]} {
    %c0 = arith.constant 0 : index
    %c0_0 = arith.constant 0 : index
    %c0_1 = arith.constant 0 : index
    %0 = vector.load %arg5[%c0, %c0_0, %c0_1] : memref<2x4x5120xf32, #tpu.memory_space<vmem>>, vector<2x4x5120xf32>
    %c0_2 = arith.constant 0 : index
    %c0_3 = arith.constant 0 : index
    %c0_4 = arith.constant 0 : index
    %1 = vector.load %arg1[%c0_2, %c0_3, %c0_4] : memref<1x1x5120xf32, #tpu.memory_space<vmem>>, vector<1x1x5120xf32>
    %c0_5 = arith.constant 0 : index
    %c0_6 = arith.constant 0 : index
    %c0_7 = arith.constant 0 : index
    %2 = vector.load %arg2[%c0_5, %c0_6, %c0_7] : memref<1x1x5120xf32, #tpu.memory_space<vmem>>, vector<1x1x5120xf32>
    %3 = vector.broadcast %1 : vector<1x1x5120xf32> to vector<2x4x5120xf32>
    %4 = arith.mulf %0, %3 : vector<2x4x5120xf32>
    %cst = arith.constant dense<0.000000e+00> : vector<4xf32>
    %5 = vector.multi_reduction <add>, %4, %cst [0, 2] : vector<2x4x5120xf32> to vector<4xf32>
    %6 = vector.shape_cast %5 : vector<4xf32> to vector<1x4x1xf32>
    %cst_8 = arith.constant 9.765625E-4 : f32
    %7 = vector.broadcast %cst_8 : f32 to vector<1x4x1xf32>
    %8 = arith.mulf %6, %7 : vector<1x4x1xf32>
    %9 = arith.mulf %0, %0 : vector<2x4x5120xf32>
    %10 = vector.broadcast %2 : vector<1x1x5120xf32> to vector<2x4x5120xf32>
    %11 = arith.mulf %9, %10 : vector<2x4x5120xf32>
    %cst_9 = arith.constant dense<0.000000e+00> : vector<4xf32>
    %12 = vector.multi_reduction <add>, %11, %cst_9 [0, 2] : vector<2x4x5120xf32> to vector<4xf32>
    %13 = vector.shape_cast %12 : vector<4xf32> to vector<1x4x1xf32>
    %cst_10 = arith.constant 9.765625E-4 : f32
    %14 = vector.broadcast %cst_10 : f32 to vector<1x4x1xf32>
    %15 = arith.mulf %13, %14 : vector<1x4x1xf32>
    %16 = arith.mulf %8, %8 : vector<1x4x1xf32>
    %17 = arith.subf %15, %16 : vector<1x4x1xf32>
    %cst_11 = arith.constant 0.000000e+00 : f32
    %18 = vector.broadcast %cst_11 : f32 to vector<1x4x1xf32>
    %19 = arith.maximumf %17, %18 : vector<1x4x1xf32>
    %c0_12 = arith.constant 0 : index
    %c0_13 = arith.constant 0 : index
    %c0_14 = arith.constant 0 : index
    %20 = vector.load %arg3[%c0_12, %c0_13, %c0_14] : memref<1x4x1xf32, #tpu.memory_space<vmem>>, vector<1x4x1xf32>
    %cst_15 = arith.constant 1.000000e-32 : f32
    %21 = vector.broadcast %cst_15 : f32 to vector<1x4x1xf32>
    %22 = arith.addf %19, %21 : vector<1x4x1xf32>
    %23 = math.rsqrt %22 : vector<1x4x1xf32>
    %24 = arith.mulf %20, %23 : vector<1x4x1xf32>
    %c0_16 = arith.constant 0 : index
    %c0_17 = arith.constant 0 : index
    %c0_18 = arith.constant 0 : index
    %25 = vector.load %arg4[%c0_16, %c0_17, %c0_18] : memref<1x4x1xf32, #tpu.memory_space<vmem>>, vector<1x4x1xf32>
    %26 = arith.mulf %8, %24 : vector<1x4x1xf32>
    %27 = arith.subf %25, %26 : vector<1x4x1xf32>
    %28 = vector.broadcast %24 : vector<1x4x1xf32> to vector<2x4x5120xf32>
    %29 = arith.mulf %0, %28 : vector<2x4x5120xf32>
    %30 = vector.broadcast %1 : vector<1x1x5120xf32> to vector<1x4x5120xf32>
    %31 = vector.broadcast %27 : vector<1x4x1xf32> to vector<1x4x5120xf32>
    %32 = arith.mulf %30, %31 : vector<1x4x5120xf32>
    %33 = vector.broadcast %32 : vector<1x4x5120xf32> to vector<2x4x5120xf32>
    %34 = arith.addf %29, %33 : vector<2x4x5120xf32>
    %c0_19 = arith.constant 0 : index
    %c0_20 = arith.constant 0 : index
    %c0_21 = arith.constant 0 : index
    %35 = vector.load %arg6[%c0_19, %c0_20, %c0_21] : memref<2x4x5120xf32, #tpu.memory_space<vmem>>, vector<2x4x5120xf32>
    tpu.vector_store %arg6[%c0_19, %c0_20, %c0_21], %34 {strides = array<i32>} : memref<2x4x5120xf32, #tpu.memory_space<vmem>>, vector<2x4x5120xf32>,
    return
  }
  func.func @transform_0(%arg0: i32) -> (i32, i32, i32) {
    %c0_i32 = arith.constant 0 : i32
    %c0_i32_0 = arith.constant 0 : i32
    %c0_i32_1 = arith.constant 0 : i32
    %c0_i32_2 = arith.constant 0 : i32
    return %c0_i32, %c0_i32_0, %c0_i32_1 : i32, i32, i32
  }
  func.func @transform_1(%arg0: i32) -> (i32, i32, i32) {
    %c0_i32 = arith.constant 0 : i32
    %c0_i32_0 = arith.constant 0 : i32
    %c0_i32_1 = arith.constant 0 : i32
    %c0_i32_2 = arith.constant 0 : i32
    return %c0_i32, %c0_i32_0, %c0_i32_1 : i32, i32, i32
  }
  func.func @transform_2(%arg0: i32) -> (i32, i32, i32) {
    %c0_i32 = arith.constant 0 : i32
    %c0_i32_0 = arith.constant 0 : i32
    %c0_i32_1 = arith.constant 0 : i32
    return %c0_i32, %arg0, %c0_i32_0 : i32, i32, i32
  }
  func.func @transform_3(%arg0: i32) -> (i32, i32, i32) {
    %c0_i32 = arith.constant 0 : i32
    %c0_i32_0 = arith.constant 0 : i32
    %c0_i32_1 = arith.constant 0 : i32
    return %c0_i32, %arg0, %c0_i32_0 : i32, i32, i32
  }
  func.func @transform_4(%arg0: i32) -> (i32, i32, i32) {
    %c0_i32 = arith.constant 0 : i32
    %c0_i32_0 = arith.constant 0 : i32
    %c0_i32_1 = arith.constant 0 : i32
    return %c0_i32, %arg0, %c0_i32_0 : i32, i32, i32
  }
  func.func @transform_5(%arg0: i32) -> (i32, i32, i32) {
    %c0_i32 = arith.constant 0 : i32
    %c0_i32_0 = arith.constant 0 : i32
    %c0_i32_1 = arith.constant 0 : i32
    return %c0_i32, %arg0, %c0_i32_0 : i32, i32, i32
  }
}

</mosaic_0001>

<bundles_post_ra>
// kernel: tpu_custom_call.1
= control target key start
LH: loop header
LB: loop body
LE: loop exit
PB: predicated region body
PF: predicated region fallthrough
CT: control target
= control target key end

     0   :  { %10 = vsyncpa [#allocation3], 0  ;;  %s2761_s0 = inlined_call_operand.hbm [shape: f32[1,1,5120], index: 0, kind: input, shape index: {}]   ;;  %s2762_s1 = inlined_call_operand.hbm [shape: f32[1,1,5120], index: 1, kind: input, shape index: {}]   ;;  %s2763_s2 = inlined_call_operand.vmem [shape: f32[1,4,1], index: 2, kind: input, shape index: {}]   ;;  %s2764_s3 = inlined_call_operand.vmem [shape: f32[1,4,1], index: 3, kind: input, shape index: {}]   ;;  %s2765_s4 = inlined_call_operand.hbm [shape: f32[2,4,5120], index: 4, kind: input, shape index: {}]   ;;  %s2766_s5 = inlined_call_operand.hbm [shape: f32[2,4,5120], index: 5, kind: output, shape index: {}]  }
   0x1   :  { %11 = vsyncpa [#allocation6], 0 }
   0x2   :  { %12 = vsyncpa [#allocation4], 0  ;;  %s1655_s18 = smov [#allocation5]   ;;  %s1656_s20 = smov [#allocation2]  }
   0x3   :  { %s29_s19 = sshll.u32 %s1655_s18, 4  ;;  %s19_s21 = sshll.u32 %s1656_s20, 4  ;;  %s30_s19 = int_to_ptr.vmem [resolvable:$true] %s29_s19  ;;  %s20_s21 = int_to_ptr.vmem [resolvable:$true] %s19_s21 }
   0x4   :  { %s1561_s24 = scalar_lea.hbm %s2762_s1, 640 }
   0x5   :  { %p1562_p0 = scmp.ne.s32.totalorder %s2762_s1, %s1561_s24  ;;  %p1565_p1 = scmp.lt.u32.totalorder %s1561_s24, %s2762_s1 }
   0x7   :  { %p1567_p2 = pnand %p1565_p1, %p1562_p0 }
   0x9   :  { %1570 = shalt.err (!%p1567_p2)
}
   0xa   :  { %s1571_s29 = scalar_lea.vmem %s30_s19, 640  ;;  %p1576_p4 = scmp.lt.s32.totalorder %s30_s19, %s30_s19 }
   0xb   :  { %p1572_p3 = scmp.ne.s32.totalorder %s30_s19, %s1571_s29  ;;  %p1577_p5 = scmp.lt.s32.totalorder %s1571_s29, %s1571_s29 }
   0xd   :  { %p1578_p6 = por %p1577_p5, %p1576_p4 }
   0xf   :  { %p1579_p7 = pnand %p1578_p6, %p1572_p3 }
  0x11   :  { %1582 = shalt.err (!%p1579_p7)
}
  0x12   :  { %32 = dma.hbm_to_vmem [thread:$0]  %s2762_s1, 640, %s30_s19, [#allocation6]  }
  0x13   :  { %s1583_s9 = scalar_lea.hbm %s2761_s0, 640 }
  0x14   :  { %p1584_p8 = scmp.ne.s32.totalorder %s2761_s0, %s1583_s9  ;;  %p1587_p9 = scmp.lt.u32.totalorder %s1583_s9, %s2761_s0 }
  0x16   :  { %p1589_p10 = pnand %p1587_p9, %p1584_p8 }
  0x18   :  { %1592 = shalt.err (!%p1589_p10)
}
  0x19   :  { %s1593_s14 = scalar_lea.vmem %s20_s21, 640  ;;  %p1598_p12 = scmp.lt.s32.totalorder %s20_s21, %s20_s21 }
  0x1a   :  { %p1594_p11 = scmp.ne.s32.totalorder %s20_s21, %s1593_s14  ;;  %p1599_p13 = scmp.lt.s32.totalorder %s1593_s14, %s1593_s14 }
  0x1c   :  { %p1600_p0 = por %p1599_p13, %p1598_p12 }
  0x1e   :  { %p1601_p1 = pnand %p1600_p0, %p1594_p11 }
  0x20   :  { %1604 = shalt.err (!%p1601_p1)
}
  0x21   :  { %22 = dma.hbm_to_vmem [thread:$0]  %s2761_s0, 640, %s20_s21, [#allocation3]  }
  0x22   :  { %s1657_s16 = smov [#allocation7]   ;;  %s1605_s20 = scalar_lea.hbm %s2765_s4, 5120 }
  0x23   :  { %s42_s17 = sshll.u32 %s1657_s16, 4  ;;  %p1606_p2 = scmp.ne.s32.totalorder %s2765_s4, %s1605_s20  ;;  %s43_s17 = int_to_ptr.vmem [resolvable:$true] %s42_s17 }
  0x24   :  { %p1609_p3 = scmp.lt.u32.totalorder %s1605_s20, %s2765_s4 }
  0x26   :  { %p1611_p4 = pnand %p1609_p3, %p1606_p2 }
  0x28   :  { %1614 = shalt.err (!%p1611_p4)
}
  0x29   :  { %s1615_s26 = scalar_lea.vmem %s43_s17, 5120  ;;  %p1620_p6 = scmp.lt.s32.totalorder %s43_s17, %s43_s17 }
  0x2a   :  { %p1616_p5 = scmp.ne.s32.totalorder %s43_s17, %s1615_s26  ;;  %p1621_p7 = scmp.lt.s32.totalorder %s1615_s26, %s1615_s26 }
  0x2c   :  { %p1622_p8 = por %p1621_p7, %p1620_p6 }
  0x2e   :  { %p1623_p9 = pnand %p1622_p8, %p1616_p5 }
  0x30   :  { %1626 = shalt.err (!%p1623_p9)
}
  0x31   :  { %s1658_s0 = smov 2560   ;;  %s1659_s21 = smov 160  }
  0x32   :  { %48 = dma.hbm_to_vmem [thread:$0]  %s2765_s4, 5120, %s43_s17, [#allocation6], %s1658_s0, %s1658_s0, %s1659_s21  }
  0x33   :  { %1649 = dma.done.wait [#allocation3], 640  }
  0x34   :  { %1650 = vsyncadd [#allocation3], 4294966656 }
  0x35   :  { %1651 = dma.done.wait [#allocation6], 5760  }
  0x36   :  { %1652 = vsyncadd [#allocation6], 4294961536  ;;  %v113_v0 = vlaneseq  ;;  %v98_v4 = vld [vmem:[#allocation2] sm:$0xff]  ;;  %v1768_v14 = vld [vmem:[#allocation7] sm:$0xff]  ;;  %vm473_vm0 = vcmask 1043456  }
  0x37   :  { %v1786_v20 = vld [vmem:[#allocation7 + $0x8] sm:$0xff]  ;;  %v99_v22 = vld [vmem:[#allocation2 + $0x8] sm:$0xff]  ;;  %v1802_v27 = vld [vmem:[#allocation7 + $0x10] sm:$0xff] }
  0x38   :  { %v1732_v1 = vshrl.u32 %v113_v0, 7  ;;  %v1816_v34 = vld [vmem:[#allocation7 + $0x18] sm:$0xff]  ;;  %v1834_v45 = vld [vmem:[#allocation7 + $0x20] sm:$0xff]  ;;  %v1850_v55 = vld [vmem:[#allocation7 + $0x28] sm:$0xff] }
  0x39   :  { %v100_v61 = vld [vmem:[#allocation2 + $0x10] sm:$0xff] }
  0x3a   :  { %2821 = vst [vmem:[#allocation12_spill] sm:$0xff] %v1732_v1  ;;  %v1735_v2 = vsub.s32 0, %v1732_v1  ;;  %v1738_v3 = vsub.s32 1, %v1732_v1  ;;  %v1741_v5 = vsub.s32 2, %v1732_v1  ;;  %v1744_v6 = vsub.s32 3, %v1732_v1 }
  0x3b   :  { %v1759_v11 = vsub.s32 4, %v1732_v1  ;;  %v1762_v12 = vsub.s32 5, %v1732_v1  ;;  %v1771_v15 = vsub.s32 6, %v1732_v1  ;;  %v1780_v18 = vsub.s32 7, %v1732_v1 }
  0x3c   :  { %v1747_v7 = vrot.slane %v98_v4, %v1735_v2  ;;  %v1750_v8 = vrot.slane %v98_v4, %v1738_v3  ;;  %v1753_v9 = vrot.slane %v98_v4, %v1741_v5  ;;  %v1756_v10 = vrot.slane %v98_v4, %v1744_v6 }
  0x3d   :  { %v1774_v16 = vrot.slane %v98_v4, %v1759_v11  ;;  %v1777_v17 = vrot.slane %v98_v4, %v1762_v12  ;;  %v1791_v23 = vrot.slane %v98_v4, %v1771_v15  ;;  %v1794_v24 = vrot.slane %v98_v4, %v1780_v18 }
  0x3e   :  { %2822 = vst [vmem:[#allocation13_spill] sm:$0xff] %v1747_v7  ;;  %2823 = vst [vmem:[#allocation14_spill] sm:$0xff] %v1750_v8  ;;  %v1766_v13 = vcombine.low %v1747_v7, %v1750_v8  ;;  %v1784_v19 = vcombine.low %v1753_v9, %v1756_v10  ;;  %v1805_v29 = vrot.slane %v99_v22, %v1735_v2  ;;  %v2052_v7 = vld [vmem:[#allocation7 + $0x88] sm:$0xff] }
  0x3f   :  { %2824 = vst [vmem:[#allocation15_spill] sm:$0xff] %v1753_v9  ;;  %2825 = vst [vmem:[#allocation16_spill] sm:$0xff] %v1756_v10  ;;  %v1798_v25 = vcombine.low %v1774_v16, %v1777_v17  ;;  %v1808_v30 = vrot.slane %v99_v22, %v1738_v3  ;;  %v1812_v31 = vcombine.low %v1791_v23, %v1794_v24 }
  0x40   :  { %2826 = vst [vmem:[#allocation17_spill] sm:$0xff] %v1774_v16  ;;  %2827 = vst [vmem:[#allocation18_spill] sm:$0xff] %v1777_v17  ;;  %v313_v21 = vmul.f32 %v1766_v13, %v1768_v14  ;;  %v314_v26 = vmul.f32 %v1784_v19, %v1786_v20  ;;  %v1822_v38 = vrot.slane %v99_v22, %v1741_v5 }
  0x41   :  { %2828 = vst [vmem:[#allocation19_spill] sm:$0xff] %v1791_v23  ;;  %2829 = vst [vmem:[#allocation20_spill] sm:$0xff] %v1794_v24  ;;  %v315_v32 = vmul.f32 %v1798_v25, %v1802_v27  ;;  %v1825_v39 = vrot.slane %v99_v22, %v1744_v6  ;;  %v1829_v41 = vcombine.low %v1805_v29, %v1808_v30  ;;  %v2013_v23 = vld [vmem:[#allocation5] sm:$0xff] }
  0x42   :  { %v393_v28 = vcombine.high %v313_v21, %v313_v21  ;;  %2830 = vst [vmem:[#allocation21_spill] sm:$0xff] %v1805_v29  ;;  %2831 = vst [vmem:[#allocation22_spill] sm:$0xff] %v1808_v30  ;;  %v394_v33 = vcombine.high %v314_v26, %v314_v26  ;;  %v474_v35 = vsel %vm473_vm0, %v313_v21, 0.0  ;;  %v477_v37 = vsel %vm473_vm0, %v314_v26, 0.0  ;;  %v1866_v21 = vld [vmem:[#allocation7 + $0x30] sm:$0xff] }
  0x43   :  { %2832 = vst [vmem:[#allocation23_spill] sm:$0xff] %v1822_v38  ;;  %2833 = vst [vmem:[#allocation24_spill] sm:$0xff] %v1825_v39  ;;  %v316_v42 = vmul.f32 %v1812_v31, %v1816_v34  ;;  %v395_v43 = vcombine.high %v315_v32, %v315_v32  ;;  %v481_v47 = vsel %vm473_vm0, %v315_v32, 0.0  ;;  %v1838_v48 = vrot.slane %v99_v22, %v1759_v11 }
  0x44   :  { %v475_v36 = vsel %vm473_vm0, %v393_v28, 0.0  ;;  %v479_v44 = vsel %vm473_vm0, %v394_v33, 0.0  ;;  %v1841_v49 = vrot.slane %v99_v22, %v1762_v12  ;;  %v1845_v51 = vcombine.low %v1822_v38, %v1825_v39  ;;  %2865 = vst [vmem:[#allocation56_spill] sm:$0xff] %v2052_v7 }
  0x45   :  { %v476_v40 = vadd.f32 %v475_v36, %v474_v35  ;;  %2834 = vst [vmem:[#allocation25_spill] sm:$0xff] %v1838_v48  ;;  %v317_v52 = vmul.f32 %v1829_v41, %v1834_v45  ;;  %v396_v53 = vcombine.high %v316_v42, %v316_v42  ;;  %v483_v54 = vsel %vm473_vm0, %v395_v43, 0.0 }
  0x46   :  { %2835 = vst [vmem:[#allocation26_spill] sm:$0xff] %v1841_v49  ;;  %v485_v57 = vsel %vm473_vm0, %v316_v42, 0.0  ;;  %v1854_v58 = vrot.slane %v99_v22, %v1771_v15  ;;  %v1857_v59 = vrot.slane %v99_v22, %v1780_v18  ;;  %v1861_v62 = vcombine.low %v1838_v48, %v1841_v49  ;;  %v1882_v42 = vld [vmem:[#allocation7 + $0x38] sm:$0xff] }
  0x47   :  { %v478_v46 = vadd.f32 %v477_v37, %v476_v40  ;;  %v318_v63 = vmul.f32 %v1845_v51, %v1850_v55  ;;  %v397_v0 = vcombine.high %v317_v52, %v317_v52  ;;  %v487_v4 = vsel %vm473_vm0, %v396_v53, 0.0 }
  0x48   :  { %2836 = vst [vmem:[#allocation27_spill] sm:$0xff] %v1854_v58  ;;  %2837 = vst [vmem:[#allocation28_spill] sm:$0xff] %v1857_v59  ;;  %v489_v28 = vsel %vm473_vm0, %v317_v52, 0.0  ;;  %v1870_v22 = vrot.slane %v100_v61, %v1735_v2  ;;  %v1873_v32 = vrot.slane %v100_v61, %v1738_v3  ;;  %v1877_v35 = vcombine.low %v1854_v58, %v1857_v59 }
  0x49   :  { %v480_v50 = vadd.f32 %v479_v44, %v478_v46  ;;  %v319_v36 = vmul.f32 %v1861_v62, %v1866_v21  ;;  %v398_v37 = vcombine.high %v318_v63, %v318_v63  ;;  %v491_v40 = vsel %vm473_vm0, %v397_v0, 0.0 }
  0x4a   :  { %2838 = vst [vmem:[#allocation29_spill] sm:$0xff] %v1870_v22  ;;  %2839 = vst [vmem:[#allocation30_spill] sm:$0xff] %v1873_v32  ;;  %v493_v44 = vsel %vm473_vm0, %v318_v63, 0.0  ;;  %v1886_v46 = vrot.slane %v100_v61, %v1741_v5  ;;  %v1893_v52 = vcombine.low %v1870_v22, %v1873_v32  ;;  %v320_v53 = vmul.f32 %v1877_v35, %v1882_v42 }
  0x4b   :  { %v482_v56 = vadd.f32 %v481_v47, %v480_v50  ;;  %v1889_v47 = vrot.slane %v100_v61, %v1744_v6  ;;  %v497_v63 = vsel %vm473_vm0, %v319_v36, 0.0  ;;  %v1902_v0 = vrot.slane %v100_v61, %v1759_v11 }
  0x4c   :  { %2840 = vst [vmem:[#allocation31_spill] sm:$0xff] %v1886_v46  ;;  %v684_v16 = vrot.slane %v2013_v23, %v1735_v2  ;;  %v688_v10 = vrot.slane %v2013_v23, %v1738_v3 }
  0x4d   :  { %v484_v60 = vadd.f32 %v483_v54, %v482_v56  ;;  %2841 = vst [vmem:[#allocation32_spill] sm:$0xff] %v1889_v47  ;;  %v399_v54 = vcombine.high %v319_v36, %v319_v36  ;;  %v495_v56 = vsel %vm473_vm0, %v398_v37, 0.0  ;;  %2842 = vst [vmem:[#allocation33_spill] sm:$0xff] %v1902_v0  ;;  %v400_v37 = vcombine.high %v320_v53, %v320_v53 }
  0x4f   :  { %v486_v26 = vadd.f32 %v485_v57, %v484_v60  ;;  %v1898_v57 = vld [vmem:[#allocation7 + $0x40] sm:$0xff] }
  0x51   :  { %v488_v33 = vadd.f32 %v487_v4, %v486_v26  ;;  %v1905_v4 = vrot.slane %v100_v61, %v1762_v12 }
  0x53   :  { %v490_v43 = vadd.f32 %v489_v28, %v488_v33  ;;  %2843 = vst [vmem:[#allocation34_spill] sm:$0xff] %v1905_v4  ;;  %v1909_v28 = vcombine.low %v1886_v46, %v1889_v47  ;;  %v321_v33 = vmul.f32 %v1893_v52, %v1898_v57  ;;  %v101_v47 = vld [vmem:[#allocation2 + $0x18] sm:$0xff]  ;;  %v1925_v46 = vcombine.low %v1902_v0, %v1905_v4 }
  0x54   :  { %v1950_v58 = vrot.slane %v101_v47, %v1741_v5  ;;  %v1966_v48 = vrot.slane %v101_v47, %v1759_v11  ;;  %v1982_v38 = vrot.slane %v101_v47, %v1771_v15 }
  0x55   :  { %v492_v50 = vadd.f32 %v491_v40, %v490_v43  ;;  %v499_v40 = vsel %vm473_vm0, %v399_v54, 0.0  ;;  %v1914_v43 = vld [vmem:[#allocation7 + $0x48] sm:$0xff]  ;;  %v401_v32 = vcombine.high %v321_v33, %v321_v33  ;;  %v505_v22 = vsel %vm473_vm0, %v321_v33, 0.0 }
  0x56   :  { %v322_v54 = vmul.f32 %v1909_v28, %v1914_v43  ;;  %2848 = vst [vmem:[#allocation39_spill] sm:$0xff] %v1950_v58  ;;  %2850 = vst [vmem:[#allocation41_spill] sm:$0xff] %v1966_v48 }
  0x57   :  { %v494_v60 = vadd.f32 %v493_v44, %v492_v50  ;;  %v501_v44 = vsel %vm473_vm0, %v320_v53, 0.0  ;;  %v1918_v50 = vrot.slane %v100_v61, %v1771_v15  ;;  %v507_v59 = vsel %vm473_vm0, %v401_v32, 0.0  ;;  %2853 = vst [vmem:[#allocation44_spill] sm:$0xff] %v1982_v38 }
  0x59   :  { %v496_v26 = vadd.f32 %v495_v56, %v494_v60  ;;  %2844 = vst [vmem:[#allocation35_spill] sm:$0xff] %v1918_v50  ;;  %v1921_v56 = vrot.slane %v100_v61, %v1780_v18  ;;  %v1934_v61 = vrot.slane %v101_v47, %v1735_v2 }
  0x5b   :  { %v498_v36 = vadd.f32 %v497_v63, %v496_v26  ;;  %2845 = vst [vmem:[#allocation36_spill] sm:$0xff] %v1921_v56  ;;  %v503_v63 = vsel %vm473_vm0, %v400_v37, 0.0  ;;  %v1930_v26 = vld [vmem:[#allocation7 + $0x50] sm:$0xff]  ;;  %2846 = vst [vmem:[#allocation37_spill] sm:$0xff] %v1934_v61  ;;  %v1941_v4 = vcombine.low %v1918_v50, %v1921_v56  ;;  %v402_v37 = vcombine.high %v322_v54, %v322_v54 }
  0x5c   :  { %v323_v0 = vmul.f32 %v1925_v46, %v1930_v26 }
  0x5d   :  { %v500_v60 = vadd.f32 %v499_v40, %v498_v36  ;;  %v1937_v40 = vrot.slane %v101_v47, %v1738_v3  ;;  %v511_v49 = vsel %vm473_vm0, %v402_v37, 0.0 }
  0x5e   :  { %v403_v32 = vcombine.high %v323_v0, %v323_v0 }
  0x5f   :  { %v502_v53 = vadd.f32 %v501_v44, %v500_v60  ;;  %2847 = vst [vmem:[#allocation38_spill] sm:$0xff] %v1937_v40  ;;  %v1946_v44 = vld [vmem:[#allocation7 + $0x58] sm:$0xff]  ;;  %v509_v60 = vsel %vm473_vm0, %v322_v54, 0.0  ;;  %v1957_v56 = vcombine.low %v1934_v61, %v1937_v40 }
  0x60   :  { %v324_v50 = vmul.f32 %v1941_v4, %v1946_v44  ;;  %v515_v39 = vsel %vm473_vm0, %v403_v32, 0.0 }
  0x61   :  { %v504_v36 = vadd.f32 %v503_v63, %v502_v53  ;;  %v1953_v63 = vrot.slane %v101_v47, %v1744_v6 }
  0x62   :  { %v404_v37 = vcombine.high %v324_v50, %v324_v50 }
  0x63   :  { %v506_v33 = vadd.f32 %v505_v22, %v504_v36  ;;  %2849 = vst [vmem:[#allocation40_spill] sm:$0xff] %v1953_v63  ;;  %v1962_v22 = vld [vmem:[#allocation7 + $0x60] sm:$0xff]  ;;  %v513_v36 = vsel %vm473_vm0, %v323_v0, 0.0  ;;  %v1973_v40 = vcombine.low %v1950_v58, %v1953_v63  ;;  %v102_v63 = vld [vmem:[#allocation2 + $0x20] sm:$0xff] }
  0x64   :  { %v325_v61 = vmul.f32 %v1957_v56, %v1962_v22  ;;  %v2016_v17 = vrot.slane %v102_v63, %v1741_v5 }
  0x65   :  { %v508_v53 = vadd.f32 %v507_v59, %v506_v33  ;;  %v1969_v59 = vrot.slane %v101_v47, %v1762_v12  ;;  %2852 = vst [vmem:[#allocation43_spill] sm:$0xff] %v1973_v40 }
  0x66   :  { %v405_v30 = vcombine.high %v325_v61, %v325_v61  ;;  %v521_v29 = vsel %vm473_vm0, %v325_v61, 0.0  ;;  %2859 = vst [vmem:[#allocation50_spill] sm:$0xff] %v2016_v17 }
  0x67   :  { %v510_v54 = vadd.f32 %v509_v60, %v508_v53  ;;  %2851 = vst [vmem:[#allocation42_spill] sm:$0xff] %v1969_v59  ;;  %v1978_v60 = vld [vmem:[#allocation7 + $0x68] sm:$0xff]  ;;  %v517_v53 = vsel %vm473_vm0, %v324_v50, 0.0  ;;  %v1989_v58 = vcombine.low %v1966_v48, %v1969_v59 }
  0x68   :  { %v326_v32 = vmul.f32 %v1973_v40, %v1978_v60  ;;  %v523_v24 = vsel %vm473_vm0, %v405_v30, 0.0 }
  0x69   :  { %v512_v33 = vadd.f32 %v511_v49, %v510_v54  ;;  %v1985_v49 = vrot.slane %v101_v47, %v1780_v18  ;;  %2855 = vst [vmem:[#allocation46_spill] sm:$0xff] %v1989_v58  ;;  %v1998_v47 = vrot.slane %v102_v63, %v1735_v2 }
  0x6b   :  { %v514_v0 = vadd.f32 %v513_v36, %v512_v33  ;;  %2854 = vst [vmem:[#allocation45_spill] sm:$0xff] %v1985_v49  ;;  %v519_v36 = vsel %vm473_vm0, %v404_v37, 0.0  ;;  %v1994_v33 = vld [vmem:[#allocation7 + $0x70] sm:$0xff]  ;;  %2856 = vst [vmem:[#allocation47_spill] sm:$0xff] %v1998_v47  ;;  %v2005_v59 = vcombine.low %v1982_v38, %v1985_v49  ;;  %v406_v37 = vcombine.high %v326_v32, %v326_v32 }
  0x6c   :  { %v327_v48 = vmul.f32 %v1989_v58, %v1994_v33 }
  0x6d   :  { %v516_v54 = vadd.f32 %v515_v39, %v514_v0  ;;  %v2001_v39 = vrot.slane %v102_v63, %v1738_v3  ;;  %2858 = vst [vmem:[#allocation49_spill] sm:$0xff] %v2005_v59 }
  0x6e   :  { %v407_v38 = vcombine.high %v327_v48, %v327_v48 }
  0x6f   :  { %v518_v50 = vadd.f32 %v517_v53, %v516_v54  ;;  %2857 = vst [vmem:[#allocation48_spill] sm:$0xff] %v2001_v39  ;;  %v2010_v53 = vld [vmem:[#allocation7 + $0x78] sm:$0xff]  ;;  %v525_v54 = vsel %vm473_vm0, %v326_v32, 0.0  ;;  %v2023_v49 = vcombine.low %v1998_v47, %v2001_v39  ;;  %v2028_v32 = vld [vmem:[#allocation7 + $0x80] sm:$0xff]  ;;  %v2039_v39 = vrot.slane %v102_v63, %v1762_v12 }
  0x70   :  { %v328_v30 = vmul.f32 %v2005_v59, %v2010_v53  ;;  %v2059_v59 = vrot.slane %v102_v63, %v1771_v15 }
  0x71   :  { %v520_v0 = vadd.f32 %v519_v36, %v518_v50  ;;  %v2019_v36 = vrot.slane %v102_v63, %v1744_v6  ;;  %2861 = vst [vmem:[#allocation52_spill] sm:$0xff] %v2023_v49  ;;  %2863 = vst [vmem:[#allocation54_spill] sm:$0xff] %v2039_v39  ;;  %v329_v9 = vmul.f32 %v2023_v49, %v2028_v32 }
  0x72   :  { %v408_v8 = vcombine.high %v328_v30, %v328_v30  ;;  %2867 = vst [vmem:[#allocation58_spill] sm:$0xff] %v2059_v59  ;;  %v637_v49 = vmul.f32 %v1786_v20, %v1786_v20  ;;  %v2080_v20 = vld [vmem:[#allocation7 + $0x90] sm:$0xff] }
  0x73   :  { %v522_v61 = vadd.f32 %v521_v29, %v520_v0  ;;  %2860 = vst [vmem:[#allocation51_spill] sm:$0xff] %v2019_v36  ;;  %v527_v29 = vsel %vm473_vm0, %v406_v37, 0.0  ;;  %v692_v37 = vrot.slane %v2013_v23, %v1741_v5  ;;  %2871 = vst [vmem:[#allocation62_spill] sm:$0xff] %v2080_v20  ;;  %v537_v58 = vsel %vm473_vm0, %v329_v9, 0.0 }
  0x75   :  { %v524_v50 = vadd.f32 %v523_v24, %v522_v61  ;;  %v2035_v24 = vrot.slane %v102_v63, %v1759_v11  ;;  %v529_v61 = vsel %vm473_vm0, %v327_v48, 0.0  ;;  %v531_v48 = vsel %vm473_vm0, %v407_v38, 0.0 }
  0x77   :  { %v526_v0 = vadd.f32 %v525_v54, %v524_v50  ;;  %2862 = vst [vmem:[#allocation53_spill] sm:$0xff] %v2035_v24  ;;  %v696_v54 = vrot.slane %v2013_v23, %v1744_v6  ;;  %v2047_v50 = vcombine.low %v2016_v17, %v2019_v36  ;;  %v2062_v36 = vrot.slane %v102_v63, %v1780_v18 }
  0x78   :  { %v533_v17 = vsel %vm473_vm0, %v328_v30, 0.0  ;;  %v409_v30 = vcombine.high %v329_v9, %v329_v9 }
  0x79   :  { %v528_v47 = vadd.f32 %v527_v29, %v526_v0  ;;  %2864 = vst [vmem:[#allocation55_spill] sm:$0xff] %v2047_v50  ;;  %v636_v29 = vmul.f32 %v1768_v14, %v1768_v14  ;;  %v2056_v0 = vcombine.low %v684_v16, %v688_v10  ;;  %2868 = vst [vmem:[#allocation59_spill] sm:$0xff] %v2062_v36 }
  0x7a   :  { %v704_v14 = vrot.slane %v2013_v23, %v1762_v12  ;;  %v2071_v10 = vcombine.low %v692_v37, %v696_v54  ;;  %v2075_v16 = vcombine.low %v2035_v24, %v2039_v39  ;;  %v330_v63 = vmul.f32 %v2047_v50, %v2052_v7  ;;  %v2088_v24 = vld [vmem:[#allocation5 + $0x8] sm:$0xff]  ;;  %v2136_v7 = vld [vmem:[#allocation7 + $0xa8] sm:$0xff] }
  0x7b   :  { %v530_v1 = vadd.f32 %v529_v61, %v528_v47  ;;  %2866 = vst [vmem:[#allocation57_spill] sm:$0xff] %v2056_v0  ;;  %v700_v47 = vrot.slane %v2013_v23, %v1759_v11  ;;  %v535_v61 = vsel %vm473_vm0, %v408_v8, 0.0  ;;  %v638_v37 = vmul.f32 %v1802_v27, %v1802_v27 }
  0x7c   :  { %2869 = vst [vmem:[#allocation60_spill] sm:$0xff] %v2071_v10  ;;  %2870 = vst [vmem:[#allocation61_spill] sm:$0xff] %v2075_v16  ;;  %v708_v54 = vrot.slane %v2013_v23, %v1771_v15  ;;  %v712_v50 = vrot.slane %v2013_v23, %v1780_v18  ;;  %v331_v9 = vmul.f32 %v2075_v16, %v2080_v20 }
  0x7d   :  { %v532_v38 = vadd.f32 %v531_v48, %v530_v1  ;;  %v881_v48 = vmul.f32 %v2056_v0, %v636_v29  ;;  %v2092_v8 = vcombine.low %v700_v47, %v704_v14  ;;  %v2097_v29 = vcombine.low %v2059_v59, %v2062_v36  ;;  %v2120_v0 = vld [vmem:[#allocation7 + $0xa0] sm:$0xff] }
  0x7e   :  { %v410_v27 = vcombine.high %v330_v63, %v330_v63  ;;  %v639_v23 = vmul.f32 %v1816_v34, %v1816_v34  ;;  %v541_v14 = vsel %vm473_vm0, %v330_v63, 0.0  ;;  %v716_v36 = vrot.slane %v2088_v24, %v1735_v2 }
  0x7f   :  { %v534_v1 = vadd.f32 %v533_v17, %v532_v38  ;;  %2872 = vst [vmem:[#allocation63_spill] sm:$0xff] %v2092_v8  ;;  %v882_v17 = vmul.f32 %v2071_v10, %v637_v49  ;;  %2873 = vst [vmem:[#allocation64_spill] sm:$0xff] %v2097_v29  ;;  %v539_v38 = vsel %vm473_vm0, %v409_v30, 0.0  ;;  %v961_v47 = vcombine.high %v881_v48, %v881_v48 }
  0x80   :  { %v640_v49 = vmul.f32 %v1834_v45, %v1834_v45  ;;  %v720_v59 = vrot.slane %v2088_v24, %v1738_v3  ;;  %v2113_v30 = vcombine.low %v708_v54, %v712_v50  ;;  %v411_v10 = vcombine.high %v331_v9, %v331_v9 }
  0x81   :  { %v536_v39 = vadd.f32 %v535_v61, %v534_v1  ;;  %v2102_v61 = vld [vmem:[#allocation7 + $0x98] sm:$0xff]  ;;  %v543_v63 = vsel %vm473_vm0, %v410_v27, 0.0  ;;  %v545_v45 = vsel %vm473_vm0, %v331_v9, 0.0  ;;  %v724_v40 = vrot.slane %v2088_v24, %v1741_v5 }
  0x82   :  { %2874 = vst [vmem:[#allocation65_spill] sm:$0xff] %v2102_v61  ;;  %v332_v34 = vmul.f32 %v2097_v29, %v2102_v61  ;;  %v1041_v50 = vsel %vm473_vm0, %v881_v48, 0.0  ;;  %v1042_v54 = vsel %vm473_vm0, %v961_v47, 0.0  ;;  %v1044_v27 = vsel %vm473_vm0, %v882_v17, 0.0 }
  0x83   :  { %v538_v1 = vadd.f32 %v537_v58, %v536_v39  ;;  %v883_v58 = vmul.f32 %v2092_v8, %v638_v37  ;;  %v962_v39 = vcombine.high %v882_v17, %v882_v17  ;;  %v728_v37 = vrot.slane %v2088_v24, %v1744_v6 }
  0x84   :  { %v884_v9 = vmul.f32 %v2113_v30, %v639_v23  ;;  %v412_v48 = vcombine.high %v332_v34, %v332_v34  ;;  %v547_v47 = vsel %vm473_vm0, %v411_v10, 0.0  ;;  %v732_v23 = vrot.slane %v2088_v24, %v1759_v11 }
  0x85   :  { %v540_v16 = vadd.f32 %v539_v38, %v538_v1  ;;  %v2128_v38 = vcombine.low %v716_v36, %v720_v59  ;;  %v1043_v1 = vadd.f32 %v1042_v54, %v1041_v50  ;;  %v963_v8 = vcombine.high %v883_v58, %v883_v58 }
  0x86   :  { %v549_v36 = vsel %vm473_vm0, %v332_v34, 0.0  ;;  %v1048_v17 = vsel %vm473_vm0, %v883_v58, 0.0  ;;  %v551_v58 = vsel %vm473_vm0, %v412_v48, 0.0 }
  0x87   :  { %v542_v20 = vadd.f32 %v541_v14, %v540_v16  ;;  %v1046_v16 = vsel %vm473_vm0, %v962_v39, 0.0  ;;  %v333_v14 = vmul.f32 %v1766_v13, %v2120_v0  ;;  %v1045_v61 = vadd.f32 %v1044_v27, %v1043_v1  ;;  %v2153_v1 = vld [vmem:[#allocation7 + $0xb0] sm:$0xff] }
  0x88   :  { %v736_v13 = vrot.slane %v2088_v24, %v1762_v12  ;;  %v2146_v39 = vcombine.low %v724_v40, %v728_v37  ;;  %v885_v50 = vmul.f32 %v2128_v38, %v640_v49  ;;  %v1050_v34 = vsel %vm473_vm0, %v963_v8, 0.0 }
  0x89   :  { %v544_v29 = vadd.f32 %v543_v63, %v542_v20  ;;  %v641_v20 = vmul.f32 %v1850_v55, %v1850_v55  ;;  %v1047_v10 = vadd.f32 %v1046_v16, %v1045_v61  ;;  %v334_v55 = vmul.f32 %v1784_v19, %v2136_v7 }
  0x8a   :  { %v553_v40 = vsel %vm473_vm0, %v333_v14, 0.0  ;;  %v642_v61 = vmul.f32 %v1866_v21, %v1866_v21  ;;  %v1052_v49 = vsel %vm473_vm0, %v884_v9, 0.0  ;;  %v740_v8 = vrot.slane %v2088_v24, %v1771_v15 }
  0x8b   :  { %v546_v59 = vadd.f32 %v545_v45, %v544_v29  ;;  %v964_v29 = vcombine.high %v884_v9, %v884_v9  ;;  %v413_v45 = vcombine.high %v333_v14, %v333_v14  ;;  %v1049_v54 = vadd.f32 %v1048_v17, %v1047_v10 }
  0x8c   :  { %v744_v19 = vrot.slane %v2088_v24, %v1780_v18  ;;  %v2163_v37 = vcombine.low %v732_v23, %v736_v13  ;;  %v965_v14 = vcombine.high %v885_v50, %v885_v50  ;;  %v335_v21 = vmul.f32 %v1798_v25, %v2153_v1 }
  0x8d   :  { %v548_v63 = vadd.f32 %v547_v47, %v546_v59  ;;  %v1051_v16 = vadd.f32 %v1050_v34, %v1049_v54  ;;  %v2165_v47 = vld [vmem:[#allocation5 + $0x10] sm:$0xff]  ;;  %v886_v59 = vmul.f32 %v2146_v39, %v641_v20  ;;  %v414_v9 = vcombine.high %v334_v55, %v334_v55 }
  0x8e   :  { %v555_v17 = vsel %vm473_vm0, %v413_v45, 0.0  ;;  %v557_v23 = vsel %vm473_vm0, %v334_v55, 0.0  ;;  %v643_v13 = vmul.f32 %v1882_v42, %v1882_v42  ;;  %v1056_v20 = vsel %vm473_vm0, %v885_v50, 0.0 }
  0x8f   :  { %v550_v27 = vadd.f32 %v549_v36, %v548_v63  ;;  %v1054_v36 = vsel %vm473_vm0, %v964_v29, 0.0  ;;  %v1053_v10 = vadd.f32 %v1052_v49, %v1051_v16  ;;  %v2172_v63 = vld [vmem:[#allocation7 + $0xb8] sm:$0xff]  ;;  %v748_v29 = vrot.slane %v2165_v47, %v1735_v2  ;;  %v2189_v16 = vld [vmem:[#allocation7 + $0xc0] sm:$0xff] }
  0x90   :  { %v752_v25 = vrot.slane %v2165_v47, %v1738_v3  ;;  %v2182_v34 = vcombine.low %v740_v8, %v744_v19  ;;  %v887_v54 = vmul.f32 %v2163_v37, %v642_v61  ;;  %v1058_v55 = vsel %vm473_vm0, %v965_v14, 0.0 }
  0x91   :  { %v552_v48 = vadd.f32 %v551_v58, %v550_v27  ;;  %v1055_v45 = vadd.f32 %v1054_v36, %v1053_v10  ;;  %v966_v27 = vcombine.high %v886_v59, %v886_v59  ;;  %v336_v42 = vmul.f32 %v1812_v31, %v2172_v63 }
  0x92   :  { %v559_v50 = vsel %vm473_vm0, %v414_v9, 0.0  ;;  %v561_v8 = vsel %vm473_vm0, %v335_v21, 0.0  ;;  %v644_v19 = vmul.f32 %v1898_v57, %v1898_v57  ;;  %v1060_v61 = vsel %vm473_vm0, %v886_v59, 0.0 }
  0x93   :  { %v554_v24 = vadd.f32 %v553_v40, %v552_v48  ;;  %v415_v40 = vcombine.high %v335_v21, %v335_v21  ;;  %v1057_v49 = vadd.f32 %v1056_v20, %v1055_v45  ;;  %v756_v14 = vrot.slane %v2165_v47, %v1741_v5  ;;  %v2206_v45 = vld [vmem:[#allocation7 + $0xc8] sm:$0xff] }
  0x94   :  { %v760_v31 = vrot.slane %v2165_v47, %v1744_v6  ;;  %v2199_v36 = vcombine.low %v748_v29, %v752_v25  ;;  %v888_v10 = vmul.f32 %v2182_v34, %v643_v13  ;;  %v1062_v21 = vsel %vm473_vm0, %v966_v27, 0.0 }
  0x95   :  { %v556_v58 = vadd.f32 %v555_v17, %v554_v24  ;;  %v1059_v9 = vadd.f32 %v1058_v55, %v1057_v49  ;;  %v967_v24 = vcombine.high %v887_v54, %v887_v54  ;;  %v337_v57 = vmul.f32 %v1829_v41, %v2189_v16 }
  0x96   :  { %v563_v59 = vsel %vm473_vm0, %v415_v40, 0.0  ;;  %v565_v29 = vsel %vm473_vm0, %v336_v42, 0.0  ;;  %v645_v25 = vmul.f32 %v1914_v43, %v1914_v43  ;;  %v1064_v13 = vsel %vm473_vm0, %v887_v54, 0.0 }
  0x97   :  { %v558_v48 = vadd.f32 %v557_v23, %v556_v58  ;;  %v416_v23 = vcombine.high %v336_v42, %v336_v42  ;;  %v1061_v20 = vadd.f32 %v1060_v61, %v1059_v9  ;;  %v764_v27 = vrot.slane %v2165_v47, %v1759_v11  ;;  %v2223_v9 = vld [vmem:[#allocation7 + $0xd0] sm:$0xff] }
  0x98   :  { %v768_v41 = vrot.slane %v2165_v47, %v1762_v12  ;;  %v2216_v55 = vcombine.low %v756_v14, %v760_v31  ;;  %v889_v49 = vmul.f32 %v2199_v36, %v644_v19  ;;  %v1066_v42 = vsel %vm473_vm0, %v967_v24, 0.0 }
  0x99   :  { %v560_v17 = vadd.f32 %v559_v50, %v558_v48  ;;  %v1063_v40 = vadd.f32 %v1062_v21, %v1061_v20  ;;  %v968_v48 = vcombine.high %v888_v10, %v888_v10  ;;  %v338_v43 = vmul.f32 %v1845_v51, %v2206_v45  ;;  %v2235_v20 = vld [vmem:[#allocation5 + $0x18] sm:$0xff] }
  0x9a   :  { %v567_v54 = vsel %vm473_vm0, %v416_v23, 0.0  ;;  %v569_v14 = vsel %vm473_vm0, %v337_v57, 0.0  ;;  %v646_v31 = vmul.f32 %v1930_v26, %v1930_v26  ;;  %v1068_v19 = vsel %vm473_vm0, %v888_v10, 0.0 }
  0x9b   :  { %v562_v58 = vadd.f32 %v561_v8, %v560_v17  ;;  %v417_v8 = vcombine.high %v337_v57, %v337_v57  ;;  %v1065_v61 = vadd.f32 %v1064_v13, %v1063_v40  ;;  %v772_v24 = vrot.slane %v2165_v47, %v1771_v15 }
  0x9c   :  { %v776_v51 = vrot.slane %v2165_v47, %v1780_v18  ;;  %v2233_v21 = vcombine.low %v764_v27, %v768_v41  ;;  %v969_v57 = vcombine.high %v889_v49, %v889_v49  ;;  %v339_v26 = vmul.f32 %v1861_v62, %v2223_v9 }
  0x9d   :  { %v564_v50 = vadd.f32 %v563_v59, %v562_v58  ;;  %v1067_v23 = vadd.f32 %v1066_v42, %v1065_v61  ;;  %v890_v58 = vmul.f32 %v2216_v55, %v645_v25  ;;  %v418_v10 = vcombine.high %v338_v43, %v338_v43 }
  0x9e   :  { %v571_v13 = vsel %vm473_vm0, %v417_v8, 0.0  ;;  %v573_v27 = vsel %vm473_vm0, %v338_v43, 0.0  ;;  %v647_v41 = vmul.f32 %v1946_v44, %v1946_v44  ;;  %v1072_v25 = vsel %vm473_vm0, %v889_v49, 0.0 }
  0x9f   :  { %v566_v17 = vadd.f32 %v565_v29, %v564_v50  ;;  %v1070_v29 = vsel %vm473_vm0, %v968_v48, 0.0  ;;  %v1069_v40 = vadd.f32 %v1068_v19, %v1067_v23  ;;  %v2242_v50 = vld [vmem:[#allocation7 + $0xd8] sm:$0xff]  ;;  %v780_v48 = vrot.slane %v2235_v20, %v1735_v2  ;;  %v2259_v23 = vld [vmem:[#allocation7 + $0xe0] sm:$0xff] }
  0xa0   :  { %v784_v62 = vrot.slane %v2235_v20, %v1738_v3  ;;  %v2252_v42 = vcombine.low %v772_v24, %v776_v51  ;;  %v891_v61 = vmul.f32 %v2233_v21, %v646_v31  ;;  %v1074_v43 = vsel %vm473_vm0, %v969_v57, 0.0 }
  0xa1   :  { %v568_v59 = vadd.f32 %v567_v54, %v566_v17  ;;  %v1071_v8 = vadd.f32 %v1070_v29, %v1069_v40  ;;  %v970_v17 = vcombine.high %v890_v58, %v890_v58  ;;  %v340_v44 = vmul.f32 %v1877_v35, %v2242_v50 }
  0xa2   :  { %v575_v49 = vsel %vm473_vm0, %v418_v10, 0.0  ;;  %v577_v24 = vsel %vm473_vm0, %v339_v26, 0.0  ;;  %v648_v51 = vmul.f32 %v1962_v22, %v1962_v22  ;;  %v1076_v31 = vsel %vm473_vm0, %v890_v58, 0.0 }
  0xa3   :  { %v570_v47 = vadd.f32 %v569_v14, %v568_v59  ;;  %v419_v14 = vcombine.high %v339_v26, %v339_v26  ;;  %v1073_v19 = vadd.f32 %v1072_v25, %v1071_v8  ;;  %v788_v57 = vrot.slane %v2235_v20, %v1741_v5  ;;  %v2276_v8 = vld [vmem:[#allocation7 + $0xe8] sm:$0xff] }
  0xa4   :  { %v792_v35 = vrot.slane %v2235_v20, %v1744_v6  ;;  %v2269_v29 = vcombine.low %v780_v48, %v784_v62  ;;  %v892_v40 = vmul.f32 %v2252_v42, %v647_v41  ;;  %v1078_v26 = vsel %vm473_vm0, %v970_v17, 0.0 }
  0xa5   :  { %v572_v54 = vadd.f32 %v571_v13, %v570_v47  ;;  %v1075_v10 = vadd.f32 %v1074_v43, %v1073_v19  ;;  %v971_v47 = vcombine.high %v891_v61, %v891_v61  ;;  %v341_v22 = vmul.f32 %v1893_v52, %v2259_v23 }
  0xa6   :  { %v579_v58 = vsel %vm473_vm0, %v419_v14, 0.0  ;;  %v581_v48 = vsel %vm473_vm0, %v340_v44, 0.0  ;;  %v649_v62 = vmul.f32 %v1978_v60, %v1978_v60  ;;  %v1080_v41 = vsel %vm473_vm0, %v891_v61, 0.0 }
  0xa7   :  { %v574_v59 = vadd.f32 %v573_v27, %v572_v54  ;;  %v420_v27 = vcombine.high %v340_v44, %v340_v44  ;;  %v1077_v25 = vadd.f32 %v1076_v31, %v1075_v10  ;;  %v796_v17 = vrot.slane %v2235_v20, %v1759_v11  ;;  %v2293_v10 = vld [vmem:[#allocation7 + $0xf0] sm:$0xff] }
  0xa8   :  { %v800_v52 = vrot.slane %v2235_v20, %v1762_v12  ;;  %v2286_v43 = vcombine.low %v788_v57, %v792_v35  ;;  %v893_v19 = vmul.f32 %v2269_v29, %v648_v51  ;;  %v1082_v44 = vsel %vm473_vm0, %v971_v47, 0.0 }
  0xa9   :  { %v576_v13 = vadd.f32 %v575_v49, %v574_v59  ;;  %v1079_v14 = vadd.f32 %v1078_v26, %v1077_v25  ;;  %v972_v59 = vcombine.high %v892_v40, %v892_v40  ;;  %v342_v60 = vmul.f32 %v1909_v28, %v2276_v8  ;;  %v2305_v25 = vld [vmem:[#allocation5 + $0x20] sm:$0xff] }
  0xaa   :  { %v583_v61 = vsel %vm473_vm0, %v420_v27, 0.0  ;;  %v585_v57 = vsel %vm473_vm0, %v341_v22, 0.0  ;;  %v650_v35 = vmul.f32 %v1994_v33, %v1994_v33  ;;  %v1084_v51 = vsel %vm473_vm0, %v892_v40, 0.0 }
  0xab   :  { %v578_v54 = vadd.f32 %v577_v24, %v576_v13  ;;  %v421_v24 = vcombine.high %v341_v22, %v341_v22  ;;  %v1081_v31 = vadd.f32 %v1080_v41, %v1079_v14  ;;  %v804_v47 = vrot.slane %v2235_v20, %v1771_v15 }
  0xac   :  { %v808_v28 = vrot.slane %v2235_v20, %v1780_v18  ;;  %v2303_v26 = vcombine.low %v796_v17, %v800_v52  ;;  %v973_v22 = vcombine.high %v893_v19, %v893_v19  ;;  %v343_v33 = vmul.f32 %v1925_v46, %v2293_v10 }
  0xad   :  { %v580_v49 = vadd.f32 %v579_v58, %v578_v54  ;;  %v1083_v27 = vadd.f32 %v1082_v44, %v1081_v31  ;;  %v894_v54 = vmul.f32 %v2286_v43, %v649_v62  ;;  %v422_v40 = vcombine.high %v342_v60, %v342_v60 }
  0xae   :  { %v587_v41 = vsel %vm473_vm0, %v421_v24, 0.0  ;;  %v589_v17 = vsel %vm473_vm0, %v342_v60, 0.0  ;;  %v651_v52 = vmul.f32 %v2010_v53, %v2010_v53  ;;  %v1088_v62 = vsel %vm473_vm0, %v893_v19, 0.0 }
  0xaf   :  { %v582_v13 = vadd.f32 %v581_v48, %v580_v49  ;;  %v1086_v48 = vsel %vm473_vm0, %v972_v59, 0.0  ;;  %v1085_v14 = vadd.f32 %v1084_v51, %v1083_v27  ;;  %v2312_v49 = vld [vmem:[#allocation7 + $0xf8] sm:$0xff]  ;;  %v812_v59 = vrot.slane %v2305_v25, %v1735_v2  ;;  %v2329_v2 = vld [vmem:[#allocation7 + $0x100] sm:$0xff] }
  0xb0   :  { %v816_v46 = vrot.slane %v2305_v25, %v1738_v3  ;;  %v2322_v44 = vcombine.low %v804_v47, %v808_v28  ;;  %v895_v31 = vmul.f32 %v2303_v26, %v650_v35  ;;  %v1090_v60 = vsel %vm473_vm0, %v973_v22, 0.0 }
  0xb1   :  { %v584_v58 = vadd.f32 %v583_v61, %v582_v13  ;;  %v1087_v24 = vadd.f32 %v1086_v48, %v1085_v14  ;;  %v974_v13 = vcombine.high %v894_v54, %v894_v54  ;;  %v344_v53 = vmul.f32 %v1941_v4, %v2312_v49 }
  0xb2   :  { %v591_v19 = vsel %vm473_vm0, %v422_v40, 0.0  ;;  %v593_v3 = vsel %vm473_vm0, %v343_v33, 0.0  ;;  %v652_v47 = vmul.f32 %v2028_v32, %v2028_v32  ;;  %v1092_v35 = vsel %vm473_vm0, %v894_v54, 0.0 }
  0xb3   :  { %v586_v20 = vadd.f32 %v585_v57, %v584_v58  ;;  %v423_v57 = vcombine.high %v343_v33, %v343_v33  ;;  %v1089_v51 = vadd.f32 %v1088_v62, %v1087_v24  ;;  %v820_v28 = vrot.slane %v2305_v25, %v1741_v5  ;;  %v2346_v5 = vld [vmem:[#allocation7 + $0x108] sm:$0xff]  ;;  %v2875_v62 = vld [vmem:[#allocation56_spill] sm:$0xff] }
  0xb4   :  { %v824_v4 = vrot.slane %v2305_v25, %v1744_v6  ;;  %v2339_v58 = vcombine.low %v812_v59, %v816_v46  ;;  %v896_v40 = vmul.f32 %v2322_v44, %v651_v52  ;;  %v1094_v33 = vsel %vm473_vm0, %v974_v13, 0.0 }
  0xb5   :  { %v588_v61 = vadd.f32 %v587_v41, %v586_v20  ;;  %v1091_v22 = vadd.f32 %v1090_v60, %v1089_v51  ;;  %v975_v41 = vcombine.high %v895_v31, %v895_v31  ;;  %v345_v32 = vmul.f32 %v1957_v56, %v2329_v2 }
  0xb6   :  { %v424_v14 = vcombine.high %v344_v53, %v344_v53  ;;  %v595_v54 = vsel %vm473_vm0, %v423_v57, 0.0  ;;  %v597_v6 = vsel %vm473_vm0, %v344_v53, 0.0  ;;  %v653_v59 = vmul.f32 %v2875_v62, %v2875_v62 }
  0xb7   :  { %v590_v27 = vadd.f32 %v589_v17, %v588_v61  ;;  %v1093_v20 = vadd.f32 %v1092_v35, %v1091_v22  ;;  %v1096_v52 = vsel %vm473_vm0, %v895_v31, 0.0  ;;  %v828_v46 = vrot.slane %v2305_v25, %v1759_v11  ;;  %v2363_v11 = vld [vmem:[#allocation7 + $0x110] sm:$0xff] }
  0xb8   :  { %v832_v56 = vrot.slane %v2305_v25, %v1762_v12  ;;  %v2356_v24 = vcombine.low %v820_v28, %v824_v4  ;;  %v897_v60 = vmul.f32 %v2339_v58, %v652_v47  ;;  %v976_v57 = vcombine.high %v896_v40, %v896_v40  ;;  %v2877_v28 = vld [vmem:[#allocation62_spill] sm:$0xff] }
  0xb9   :  { %v592_v48 = vadd.f32 %v591_v19, %v590_v27  ;;  %v1095_v61 = vadd.f32 %v1094_v33, %v1093_v20  ;;  %v1098_v53 = vsel %vm473_vm0, %v975_v41, 0.0  ;;  %v2876_v19 = vld [vmem:[#allocation43_spill] sm:$0xff]  ;;  %v425_v27 = vcombine.high %v345_v32, %v345_v32 }
  0xba   :  { %v346_v51 = vmul.f32 %v2876_v19, %v2346_v5  ;;  %v599_v31 = vsel %vm473_vm0, %v424_v14, 0.0  ;;  %v601_v12 = vsel %vm473_vm0, %v345_v32, 0.0  ;;  %v654_v4 = vmul.f32 %v2877_v28, %v2877_v28 }
  0xbb   :  { %v594_v17 = vadd.f32 %v593_v3, %v592_v48  ;;  %v1097_v3 = vadd.f32 %v1096_v52, %v1095_v61  ;;  %v1100_v47 = vsel %vm473_vm0, %v896_v40, 0.0  ;;  %v836_v22 = vrot.slane %v2305_v25, %v1771_v15  ;;  %v2380_v15 = vld [vmem:[#allocation7 + $0x118] sm:$0xff] }
  0xbc   :  { %v840_v48 = vrot.slane %v2305_v25, %v1780_v18  ;;  %v2373_v41 = vcombine.low %v828_v46, %v832_v56  ;;  %v977_v20 = vcombine.high %v897_v60, %v897_v60  ;;  %v1102_v32 = vsel %vm473_vm0, %v976_v57, 0.0  ;;  %v2879_v46 = vld [vmem:[#allocation65_spill] sm:$0xff] }
  0xbd   :  { %v596_v13 = vadd.f32 %v595_v54, %v594_v17  ;;  %v1099_v33 = vadd.f32 %v1098_v53, %v1097_v3  ;;  %v898_v54 = vmul.f32 %v2356_v24, %v653_v59  ;;  %v2878_v17 = vld [vmem:[#allocation46_spill] sm:$0xff]  ;;  %v426_v62 = vcombine.high %v346_v51, %v346_v51 }
  0xbe   :  { %v603_v40 = vsel %vm473_vm0, %v425_v27, 0.0  ;;  %v1104_v18 = vsel %vm473_vm0, %v897_v60, 0.0  ;;  %v605_v25 = vsel %vm473_vm0, %v346_v51, 0.0  ;;  %v655_v59 = vmul.f32 %v2879_v46, %v2879_v46  ;;  %v2393_v51 = vld [vmem:[#allocation7 + $0x120] sm:$0xff] }
  0xbf   :  { %v598_v35 = vadd.f32 %v597_v6, %v596_v13  ;;  %v347_v6 = vmul.f32 %v2878_v17, %v2363_v11  ;;  %v1101_v52 = vadd.f32 %v1100_v47, %v1099_v33  ;;  %v2386_v56 = vcombine.low %v836_v22, %v840_v48  ;;  %v2881_v17 = vld [vmem:[#allocation52_spill] sm:$0xff] }
  0xc0   :  { %v899_v53 = vmul.f32 %v2373_v41, %v654_v4  ;;  %v978_v19 = vcombine.high %v898_v54, %v898_v54  ;;  %v1106_v27 = vsel %vm473_vm0, %v977_v20, 0.0  ;;  %v607_v60 = vsel %vm473_vm0, %v426_v62, 0.0 }
  0xc1   :  { %v600_v14 = vadd.f32 %v599_v31, %v598_v35  ;;  %v1103_v13 = vadd.f32 %v1102_v32, %v1101_v52  ;;  %v2880_v31 = vld [vmem:[#allocation49_spill] sm:$0xff]  ;;  %v427_v35 = vcombine.high %v347_v6, %v347_v6  ;;  %v1108_v47 = vsel %vm473_vm0, %v898_v54, 0.0 }
  0xc2   :  { %v348_v3 = vmul.f32 %v2880_v31, %v2380_v15  ;;  %v609_v22 = vsel %vm473_vm0, %v347_v6, 0.0  ;;  %v656_v4 = vmul.f32 %v2120_v0, %v2120_v0  ;;  %v979_v20 = vcombine.high %v899_v53, %v899_v53  ;;  %v2404_v54 = vld [vmem:[#allocation7 + $0x128] sm:$0xff]  ;;  %v2883_v31 = vld [vmem:[#allocation55_spill] sm:$0xff] }
  0xc3   :  { %v602_v61 = vadd.f32 %v601_v12, %v600_v14  ;;  %v1105_v12 = vadd.f32 %v1104_v18, %v1103_v13  ;;  %v900_v14 = vmul.f32 %v2386_v56, %v655_v59  ;;  %v1110_v32 = vsel %vm473_vm0, %v978_v19, 0.0  ;;  %v2882_v13 = vld [vmem:[#allocation57_spill] sm:$0xff] }
  0xc4   :  { %v349_v62 = vmul.f32 %v2881_v17, %v2393_v51  ;;  %v611_v52 = vsel %vm473_vm0, %v427_v35, 0.0  ;;  %v1112_v18 = vsel %vm473_vm0, %v899_v53, 0.0  ;;  %v613_v0 = vsel %vm473_vm0, %v348_v3, 0.0  ;;  %v2415_v53 = vld [vmem:[#allocation7 + $0x130] sm:$0xff] }
  0xc5   :  { %v604_v57 = vadd.f32 %v603_v40, %v602_v61  ;;  %v1107_v48 = vadd.f32 %v1106_v27, %v1105_v12  ;;  %v428_v40 = vcombine.high %v348_v3, %v348_v3  ;;  %v980_v19 = vcombine.high %v900_v14, %v900_v14 }
  0xc6   :  { %v1114_v27 = vsel %vm473_vm0, %v979_v20, 0.0  ;;  %v350_v35 = vmul.f32 %v2883_v31, %v2404_v54  ;;  %v2884_v20 = vld [vmem:[#allocation60_spill] sm:$0xff] }
  0xc7   :  { %v606_v28 = vadd.f32 %v605_v25, %v604_v57  ;;  %v1109_v61 = vadd.f32 %v1108_v47, %v1107_v48  ;;  %v657_v25 = vmul.f32 %v2136_v7, %v2136_v7  ;;  %v901_v57 = vmul.f32 %v2882_v13, %v656_v4 }
  0xc8   :  { %v615_v12 = vsel %vm473_vm0, %v428_v40, 0.0  ;;  %v1116_v47 = vsel %vm473_vm0, %v900_v14, 0.0  ;;  %v658_v4 = vmul.f32 %v2153_v1, %v2153_v1  ;;  %v2885_v40 = vld [vmem:[#allocation61_spill] sm:$0xff]  ;;  %v2426_v14 = vld [vmem:[#allocation7 + $0x138] sm:$0xff] }
  0xc9   :  { %v608_v33 = vadd.f32 %v607_v60, %v606_v28  ;;  %v1111_v46 = vadd.f32 %v1110_v32, %v1109_v61  ;;  %v429_v60 = vcombine.high %v349_v62, %v349_v62  ;;  %v902_v32 = vmul.f32 %v2884_v20, %v657_v25 }
  0xca   :  { %v981_v17 = vcombine.high %v901_v57, %v901_v57  ;;  %v351_v61 = vmul.f32 %v2885_v40, %v2415_v53  ;;  %v659_v25 = vmul.f32 %v2172_v63, %v2172_v63  ;;  %v660_v20 = vmul.f32 %v2189_v16, %v2189_v16 }
  0xcb   :  { %v610_v6 = vadd.f32 %v609_v22, %v608_v33  ;;  %v1113_v28 = vadd.f32 %v1112_v18, %v1111_v46  ;;  %v617_v22 = vsel %vm473_vm0, %v349_v62, 0.0  ;;  %v619_v18 = vsel %vm473_vm0, %v429_v60, 0.0  ;;  %v2887_v60 = vld [vmem:[#allocation64_spill] sm:$0xff] }
  0xcc   :  { %v1120_v46 = vsel %vm473_vm0, %v901_v57, 0.0  ;;  %v904_v40 = vmul.f32 %v2113_v30, %v659_v25 }
  0xcd   :  { %v612_v59 = vadd.f32 %v611_v52, %v610_v6  ;;  %v1115_v48 = vadd.f32 %v1114_v27, %v1113_v28  ;;  %v1118_v52 = vsel %vm473_vm0, %v980_v19, 0.0  ;;  %v430_v6 = vcombine.high %v350_v35, %v350_v35  ;;  %v2886_v19 = vld [vmem:[#allocation63_spill] sm:$0xff] }
  0xce   :  { %v903_v31 = vmul.f32 %v2886_v19, %v658_v4  ;;  %v1122_v28 = vsel %vm473_vm0, %v981_v17, 0.0  ;;  %v905_v19 = vmul.f32 %v2128_v38, %v660_v20  ;;  %v984_v30 = vcombine.high %v904_v40, %v904_v40 }
  0xcf   :  { %v614_v3 = vadd.f32 %v613_v0, %v612_v59  ;;  %v1117_v0 = vadd.f32 %v1116_v47, %v1115_v48  ;;  %v621_v59 = vsel %vm473_vm0, %v350_v35, 0.0  ;;  %v431_v47 = vcombine.high %v351_v61, %v351_v61 }
  0xd0   :  { %v1124_v35 = vsel %vm473_vm0, %v902_v32, 0.0  ;;  %v983_v17 = vcombine.high %v903_v31, %v903_v31 }
  0xd1   :  { %v616_v33 = vadd.f32 %v615_v12, %v614_v3  ;;  %v1119_v13 = vadd.f32 %v1118_v52, %v1117_v0  ;;  %v982_v12 = vcombine.high %v902_v32, %v902_v32  ;;  %v352_v3 = vmul.f32 %v2887_v60, %v2426_v14 }
  0xd2   :  { %v1130_v25 = vsel %vm473_vm0, %v983_v17, 0.0 }
  0xd3   :  { %v618_v62 = vadd.f32 %v617_v22, %v616_v33  ;;  %v623_v22 = vsel %vm473_vm0, %v430_v6, 0.0  ;;  %v1121_v48 = vadd.f32 %v1120_v46, %v1119_v13  ;;  %v625_v33 = vsel %vm473_vm0, %v351_v61, 0.0 }
  0xd4   :  { %v432_v0 = vcombine.high %v352_v3, %v352_v3  ;;  %v629_v32 = vsel %vm473_vm0, %v352_v3, 0.0  ;;  %v661_v61 = vmul.f32 %v2206_v45, %v2206_v45 }
  0xd5   :  { %v620_v27 = vadd.f32 %v619_v18, %v618_v62  ;;  %v1123_v52 = vadd.f32 %v1122_v28, %v1121_v48  ;;  %v1126_v18 = vsel %vm473_vm0, %v982_v12, 0.0  ;;  %v627_v62 = vsel %vm473_vm0, %v431_v47, 0.0 }
  0xd6   :  { %v631_v12 = vsel %vm473_vm0, %v432_v0, 0.0  ;;  %v1132_v47 = vsel %vm473_vm0, %v904_v40, 0.0  ;;  %v906_v48 = vmul.f32 %v2146_v39, %v661_v61 }
  0xd7   :  { %v622_v57 = vadd.f32 %v621_v59, %v620_v27  ;;  %v1125_v6 = vadd.f32 %v1124_v35, %v1123_v52  ;;  %v1128_v59 = vsel %vm473_vm0, %v903_v31, 0.0  ;;  %v662_v31 = vmul.f32 %v2223_v9, %v2223_v9 }
  0xd8   :  { %v1134_v35 = vsel %vm473_vm0, %v984_v30, 0.0  ;;  %v663_v52 = vmul.f32 %v2242_v50, %v2242_v50  ;;  %v986_v40 = vcombine.high %v906_v48, %v906_v48  ;;  %v1140_v0 = vsel %vm473_vm0, %v906_v48, 0.0 }
  0xd9   :  { %v624_v4 = vadd.f32 %v623_v22, %v622_v57  ;;  %v1127_v13 = vadd.f32 %v1126_v18, %v1125_v6  ;;  %v985_v57 = vcombine.high %v905_v19, %v905_v19 }
  0xda   :  { %v908_v6 = vmul.f32 %v2182_v34, %v663_v52  ;;  %v666_v34 = vmul.f32 %v2293_v10, %v2293_v10 }
  0xdb   :  { %v626_v46 = vadd.f32 %v625_v33, %v624_v4  ;;  %v1129_v28 = vadd.f32 %v1128_v59, %v1127_v13  ;;  %v1136_v33 = vsel %vm473_vm0, %v905_v19, 0.0  ;;  %v907_v4 = vmul.f32 %v2163_v37, %v662_v31 }
  0xdc   :  { %v1138_v17 = vsel %vm473_vm0, %v985_v57, 0.0  ;;  %v1142_v59 = vsel %vm473_vm0, %v986_v40, 0.0  ;;  %v665_v37 = vmul.f32 %v2276_v8, %v2276_v8  ;;  %v988_v19 = vcombine.high %v908_v6, %v908_v6 }
  0xdd   :  { %v628_v27 = vadd.f32 %v627_v62, %v626_v46  ;;  %v1131_v3 = vadd.f32 %v1130_v25, %v1129_v28  ;;  %v664_v62 = vmul.f32 %v2259_v23, %v2259_v23  ;;  %v987_v46 = vcombine.high %v907_v4, %v907_v4 }
  0xde   :  { %v1144_v61 = vsel %vm473_vm0, %v907_v4, 0.0  ;;  %v1150_v31 = vsel %vm473_vm0, %v988_v19, 0.0  ;;  %v911_v57 = vmul.f32 %v2233_v21, %v666_v34  ;;  %v669_v21 = vmul.f32 %v2346_v5, %v2346_v5 }
  0xdf   :  { %v630_v60 = vadd.f32 %v629_v32, %v628_v27  ;;  %v1133_v38 = vadd.f32 %v1132_v47, %v1131_v3  ;;  %v909_v27 = vmul.f32 %v2199_v36, %v664_v62  ;;  %v1146_v30 = vsel %vm473_vm0, %v987_v46, 0.0 }
  0xe0   :  { %v667_v36 = vmul.f32 %v2312_v49, %v2312_v49  ;;  %v991_v40 = vcombine.high %v911_v57, %v911_v57 }
  0xe1   :  { %v632_v22 = vadd.f32 %v631_v12, %v630_v60  ;;  %v1135_v20 = vadd.f32 %v1134_v35, %v1133_v38  ;;  %v1148_v12 = vsel %vm473_vm0, %v908_v6, 0.0  ;;  %v910_v60 = vmul.f32 %v2216_v55, %v665_v37 }
  0xe2   :  { %v989_v47 = vcombine.high %v909_v27, %v909_v27  ;;  %v668_v55 = vmul.f32 %v2329_v2, %v2329_v2  ;;  %v912_v4 = vmul.f32 %v2252_v42, %v667_v36  ;;  %v1162_v46 = vsel %vm473_vm0, %v991_v40, 0.0 }
  0xe3   :  { %633 = vadd.xlane.f32.xlu0 %v632_v22  ;;  %v1137_v18 = vadd.f32 %v1136_v33, %v1135_v20  ;;  %v1152_v22 = vsel %vm473_vm0, %v909_v27, 0.0  ;;  %v990_v35 = vcombine.high %v910_v60, %v910_v60  ;;  %v1156_v20 = vsel %vm473_vm0, %v910_v60, 0.0 }
  0xe4   :  { %v1154_v38 = vsel %vm473_vm0, %v989_v47, 0.0  ;;  %v913_v62 = vmul.f32 %v2269_v29, %v668_v55  ;;  %v992_v6 = vcombine.high %v912_v4, %v912_v4  ;;  %v670_v42 = vmul.f32 %v2363_v11, %v2363_v11 }
  0xe5   :  { %v1139_v39 = vadd.f32 %v1138_v17, %v1137_v18  ;;  %v1158_v17 = vsel %vm473_vm0, %v990_v35, 0.0  ;;  %v671_v29 = vmul.f32 %v2380_v15, %v2380_v15 }
  0xe6   :  { %v993_v37 = vcombine.high %v913_v62, %v913_v62  ;;  %v1166_v27 = vsel %vm473_vm0, %v992_v6, 0.0 }
  0xe7   :  { %v1141_v32 = vadd.f32 %v1140_v0, %v1139_v39  ;;  %v1160_v0 = vsel %vm473_vm0, %v911_v57, 0.0 }
  0xe8   :  { %v1170_v34 = vsel %vm473_vm0, %v993_v37, 0.0 }
  0xe9   :  { %v1143_v13 = vadd.f32 %v1142_v59, %v1141_v32  ;;  %v1164_v32 = vsel %vm473_vm0, %v912_v4, 0.0 }
  0xeb   :  { %v1145_v25 = vadd.f32 %v1144_v61, %v1143_v13  ;;  %v914_v13 = vmul.f32 %v2286_v43, %v669_v21  ;;  %v672_v43 = vmul.f32 %v2393_v51, %v2393_v51 }
  0xed   :  { %v1147_v28 = vadd.f32 %v1146_v30, %v1145_v25  ;;  %v1168_v30 = vsel %vm473_vm0, %v913_v62, 0.0  ;;  %v1172_v47 = vsel %vm473_vm0, %v914_v13, 0.0 }
  0xef   :  { %v1149_v3 = vadd.f32 %v1148_v12, %v1147_v28  ;;  %v915_v12 = vmul.f32 %v2303_v26, %v670_v42  ;;  %v994_v28 = vcombine.high %v914_v13, %v914_v13  ;;  %v673_v26 = vmul.f32 %v2404_v54, %v2404_v54 }
  0xf1   :  { %v1151_v48 = vadd.f32 %v1150_v31, %v1149_v3  ;;  %v916_v3 = vmul.f32 %v2322_v44, %v671_v29  ;;  %v1176_v57 = vsel %vm473_vm0, %v915_v12, 0.0  ;;  %v674_v44 = vmul.f32 %v2415_v53, %v2415_v53 }
  0xf2   :  { %v918_v40 = vmul.f32 %v2356_v24, %v673_v26 }
  0xf3   :  { %v1153_v33 = vadd.f32 %v1152_v22, %v1151_v48  ;;  %v995_v22 = vcombine.high %v915_v12, %v915_v12  ;;  %v1174_v48 = vsel %vm473_vm0, %v994_v28, 0.0  ;;  %v1180_v55 = vsel %vm473_vm0, %v916_v3, 0.0 }
  0xf4   :  { %v919_v62 = vmul.f32 %v2373_v41, %v674_v44  ;;  %v998_v6 = vcombine.high %v918_v40, %v918_v40 }
  0xf5   :  { %v1155_v52 = vadd.f32 %v1154_v38, %v1153_v33  ;;  %v917_v38 = vmul.f32 %v2339_v58, %v672_v43  ;;  %v996_v33 = vcombine.high %v916_v3, %v916_v3  ;;  %v675_v58 = vmul.f32 %v2426_v14, %v2426_v14 }
  0xf6   :  { %v999_v42 = vcombine.high %v919_v62, %v919_v62  ;;  %v1190_v13 = vsel %vm473_vm0, %v998_v6, 0.0  ;;  %v1542_v6 = vld [vmem:[#allocation7 + $0x10] sm:$0xff] }
  0xf7   :  { %v1157_v18 = vadd.f32 %v1156_v20, %v1155_v52  ;;  %v1178_v20 = vsel %vm473_vm0, %v995_v22, 0.0  ;;  %v920_v24 = vmul.f32 %v2386_v56, %v675_v58  ;;  %v1660_v56 = vmov 0   ;;  %v1541_v58 = vld [vmem:[#allocation7 + $0x8] sm:$0xff] }
  0xf8   :  { %1536 = vset.pattern.permute.xlu1 %v1660_v56  ;;  %1537 = vset.pattern.permute.xlu0 %v1660_v56 }
  0xf9   :  { %v1159_v39 = vadd.f32 %v1158_v17, %v1157_v18  ;;  %v997_v17 = vcombine.high %v917_v38, %v917_v38  ;;  %v1182_v18 = vsel %vm473_vm0, %v996_v33, 0.0  ;;  %v1196_v29 = vsel %vm473_vm0, %v920_v24, 0.0  ;;  %v1210_v33 = vld [vmem:[%s2764_s3] sm:$0xf] }
  0xfb   :  { %v1161_v59 = vadd.f32 %v1160_v0, %v1159_v39  ;;  %v1184_v39 = vsel %vm473_vm0, %v917_v38, 0.0 }
  0xfd   :  { %v1163_v61 = vadd.f32 %v1162_v46, %v1161_v59  ;;  %v1186_v46 = vsel %vm473_vm0, %v997_v17, 0.0 }
  0xff   :  { %v1165_v19 = vadd.f32 %v1164_v32, %v1163_v61  ;;  %v1188_v32 = vsel %vm473_vm0, %v918_v40, 0.0  ;;  %v2888_v40 = vld [vmem:[#allocation12_spill] sm:$0xff] }
 0x101   :  { %v1167_v25 = vadd.f32 %v1166_v27, %v1165_v19  ;;  %v1192_v27 = vsel %vm473_vm0, %v919_v62, 0.0 }
 0x103   :  { %v1169_v60 = vadd.f32 %v1168_v30, %v1167_v25  ;;  %v1000_v30 = vcombine.high %v920_v24, %v920_v24  ;;  %v1194_v25 = vsel %vm473_vm0, %v999_v42, 0.0  ;;  %v1545_v42 = vld [vmem:[#allocation7 + $0x28] sm:$0xff] }
 0x105   :  { %v1171_v31 = vadd.f32 %v1170_v34, %v1169_v60  ;;  %v1198_v28 = vsel %vm473_vm0, %v1000_v30, 0.0 }
 0x107   :  { %v1173_v36 = vadd.f32 %v1172_v47, %v1171_v31 }
 0x109   :  { %v1175_v35 = vadd.f32 %v1174_v48, %v1173_v36 }
 0x10b   :  { %v1177_v52 = vadd.f32 %v1176_v57, %v1175_v35  ;;  %v1206_v35 = vld [vmem:[%s2763_s2] sm:$0xf]  ;;  %s1662_s2 = smov [#allocation8]  }
 0x10c   :  { %s1515_s3 = sshll.u32 %s1662_s2, 4  ;;  %s1516_s3 = int_to_ptr.vmem [resolvable:$true] %s1515_s3 }
 0x10d   :  { %v1179_v4 = vadd.f32 %v1178_v20, %v1177_v52  ;;  %s1627_s7 = scalar_lea.vmem %s1516_s3, 5120  ;;  %p1632_p11 = scmp.lt.s32.totalorder %s1516_s3, %s1516_s3 }
 0x10e   :  { %p1628_p10 = scmp.ne.s32.totalorder %s1516_s3, %s1627_s7  ;;  %p1633_p12 = scmp.lt.s32.totalorder %s1627_s7, %s1627_s7 }
 0x10f   :  { %v1181_v0 = vadd.f32 %v1180_v55, %v1179_v4  ;;  %v1661_v55 = vmov 839922192  }
 0x110   :  { %v1218_v4 = vunpack.c.l.s4 %v1661_v55  ;;  %v1559_v55 = vld [vmem:[#allocation7 + $0x98] sm:$0xff]  ;;  %p1634_p13 = por %p1633_p12, %p1632_p11 }
 0x111   :  { %v1183_v21 = vadd.f32 %v1182_v18, %v1181_v0 }
 0x112   :  { %v1219_v44 = vunpack.c.0.s8 %v1218_v4  ;;  %p1635_p0 = pnand %p1634_p13, %p1628_p10 }
 0x113   :  { %v1185_v59 = vadd.f32 %v1184_v39, %v1183_v21  ;;  %v1540_v39 = vld [vmem:[#allocation7] sm:$0xff] }
 0x114   :  { %v1222_v17 = vsub.s32 %v1219_v44, %v2888_v40  ;;  %v1560_v44 = vld [vmem:[#allocation7 + $0xa0] sm:$0xff] }
 0x115   :  { %v1187_v61 = vadd.f32 %v1186_v46, %v1185_v59  ;;  %v1543_v59 = vld [vmem:[#allocation7 + $0x18] sm:$0xff] }
 0x117   :  { %v1189_v37 = vadd.f32 %v1188_v32, %v1187_v61  ;;  %v1544_v61 = vld [vmem:[#allocation7 + $0x20] sm:$0xff] }
 0x119   :  { %v1191_v19 = vadd.f32 %v1190_v13, %v1189_v37  ;;  %v1546_v37 = vld [vmem:[#allocation7 + $0x30] sm:$0xff] }
 0x11b   :  { %v1193_v41 = vadd.f32 %v1192_v27, %v1191_v19  ;;  %v1547_v19 = vld [vmem:[#allocation7 + $0x38] sm:$0xff] }
 0x11d   :  { %v1195_v12 = vadd.f32 %v1194_v25, %v1193_v41  ;;  %v1548_v25 = vld [vmem:[#allocation7 + $0x40] sm:$0xff] }
 0x11f   :  { %v1197_v34 = vadd.f32 %v1196_v29, %v1195_v12  ;;  %v1549_v29 = vld [vmem:[#allocation7 + $0x48] sm:$0xff] }
 0x121   :  { %v1199_v60 = vadd.f32 %v1198_v28, %v1197_v34  ;;  %v1550_v28 = vld [vmem:[#allocation7 + $0x50] sm:$0xff] }
 0x123   :  { %1200 = vadd.xlane.f32.xlu0 %v1199_v60  ;;  %v1551_v60 = vld [vmem:[#allocation7 + $0x58] sm:$0xff] }
 0x170   :  { %v634_v47 = vpop.xlane.xlu0 %633 }
 0x171   :  { %v635_v31 = vmul.f32 0.0009765625, %v634_v47  ;;  %v1552_v47 = vld [vmem:[#allocation7 + $0x60] sm:$0xff] }
 0x173   :  { %v1203_v22 = vmul.f32 %v635_v31, %v635_v31 }
 0x1b0   :  { %v1201_v43 = vpop.xlane.xlu0 %1200 }
 0x1b1   :  { %v1202_v3 = vmul.f32 0.0009765625, %v1201_v43  ;;  %v1553_v43 = vld [vmem:[#allocation7 + $0x68] sm:$0xff] }
 0x1b3   :  { %v1204_v48 = vsub.f32 %v1202_v3, %v1203_v22  ;;  %v1554_v22 = vld [vmem:[#allocation7 + $0x70] sm:$0xff] }
 0x1b5   :  { %v1205_v36 = vmax.f32 %v1204_v48, 0.0 }
 0x1b7   :  { %v1207_v57 = vadd.f32 1e-32, %v1205_v36  ;;  %v1555_v36 = vld [vmem:[#allocation7 + $0x78] sm:$0xff] }
 0x1b9   :  { %1538 = vrsqrt.f32 %v1207_v57 }
 0x1c3   :  { %v1539_v26 = vpop.eup %1538 }
 0x1c4   :  { %v1209_v38 = vmul.f32 %v1539_v26, %v1206_v35  ;;  %v1556_v35 = vld [vmem:[#allocation7 + $0x80] sm:$0xff] }
 0x1c6   :  { %1215 = vperm.xlu1 %1536, %v1209_v38   ;;  %v1211_v20 = vmul.f32 %v1209_v38, %v635_v31  ;;  %v1557_v38 = vld [vmem:[#allocation7 + $0x88] sm:$0xff] }
 0x1c8   :  { %v1212_v52 = vsub.f32 %v1210_v33, %v1211_v20  ;;  %v1558_v20 = vld [vmem:[#allocation7 + $0x90] sm:$0xff] }
 0x1ca   :  { %1307 = vperm.xlu1 %1536, %v1212_v52  }
 0x245   :  { %v1216_v18 = vpop.permute.xlu1 %1215 }
 0x246   :  { %v1223_v0 = vrot.slane %v1216_v18, %v1222_v17 }
 0x248   :  { %v2535_v21 = vmul.f32 %v1540_v39, %v1223_v0  ;;  %v2537_v62 = vmul.f32 %v1541_v58, %v1223_v0  ;;  %v2539_v46 = vmul.f32 %v1542_v6, %v1223_v0  ;;  %v2541_v32 = vmul.f32 %v1543_v59, %v1223_v0 }
 0x249   :  { %v2543_v24 = vmul.f32 %v1544_v61, %v1223_v0  ;;  %v2545_v13 = vmul.f32 %v1545_v42, %v1223_v0  ;;  %v2547_v27 = vmul.f32 %v1546_v37, %v1223_v0  ;;  %v2549_v30 = vmul.f32 %v1547_v19, %v1223_v0  ;;  %v2924_v19 = vld [vmem:[#allocation14_spill] sm:$0xff] }
 0x24a   :  { %v2551_v41 = vmul.f32 %v1548_v25, %v1223_v0  ;;  %v2553_v12 = vmul.f32 %v1549_v29, %v1223_v0  ;;  %v2555_v34 = vmul.f32 %v1550_v28, %v1223_v0  ;;  %v2557_v56 = vmul.f32 %v1551_v60, %v1223_v0  ;;  %v2925_v25 = vld [vmem:[#allocation15_spill] sm:$0xff]  ;;  %v2927_v60 = vld [vmem:[#allocation17_spill] sm:$0xff] }
 0x24b   :  { %2889 = vst [vmem:[#allocation56_spill] sm:$0xff] %v2547_v27  ;;  %2890 = vst [vmem:[#allocation43_spill] sm:$0xff] %v2549_v30  ;;  %v2559_v31 = vmul.f32 %v1552_v47, %v1223_v0  ;;  %v2561_v3 = vmul.f32 %v1553_v43, %v1223_v0  ;;  %v2563_v48 = vmul.f32 %v1554_v22, %v1223_v0  ;;  %v2928_v47 = vld [vmem:[#allocation18_spill] sm:$0xff] }
 0x24c   :  { %2891 = vst [vmem:[#allocation62_spill] sm:$0xff] %v2551_v41  ;;  %2892 = vst [vmem:[#allocation46_spill] sm:$0xff] %v2553_v12  ;;  %v2565_v57 = vmul.f32 %v1555_v36, %v1223_v0  ;;  %v2567_v26 = vmul.f32 %v1556_v35, %v1223_v0  ;;  %v2569_v33 = vmul.f32 %v1557_v38, %v1223_v0  ;;  %v2930_v36 = vld [vmem:[#allocation20_spill] sm:$0xff]  ;;  %v2931_v35 = vld [vmem:[#allocation21_spill] sm:$0xff] }
 0x24d   :  { %2893 = vst [vmem:[#allocation65_spill] sm:$0xff] %v2555_v34  ;;  %2894 = vst [vmem:[#allocation49_spill] sm:$0xff] %v2557_v56  ;;  %v2571_v52 = vmul.f32 %v1558_v20, %v1223_v0  ;;  %v2573_v4 = vmul.f32 %v1559_v55, %v1223_v0  ;;  %v2575_v40 = vmul.f32 %v1560_v44, %v1223_v0  ;;  %v2933_v20 = vld [vmem:[#allocation23_spill] sm:$0xff]  ;;  %v2934_v44 = vld [vmem:[#allocation24_spill] sm:$0xff] }
 0x24e   :  { %2895 = vst [vmem:[#allocation52_spill] sm:$0xff] %v2559_v31  ;;  %2896 = vst [vmem:[#allocation57_spill] sm:$0xff] %v2561_v3  ;;  %v2578_v17 = vmul.f32 %v1223_v0, %v2136_v7  ;;  %v2581_v18 = vmul.f32 %v1223_v0, %v2153_v1  ;;  %v2584_v39 = vmul.f32 %v1223_v0, %v2172_v63  ;;  %v1308_v7 = vpop.permute.xlu1 %1307  ;;  %v2962_v3 = vld [vmem:[#allocation59_spill] sm:$0xff] }
 0x24f   :  { %2897 = vst [vmem:[#allocation55_spill] sm:$0xff] %v2563_v48  ;;  %2898 = vst [vmem:[#allocation60_spill] sm:$0xff] %v2565_v57  ;;  %v2587_v58 = vmul.f32 %v1223_v0, %v2189_v16  ;;  %v2590_v6 = vmul.f32 %v1223_v0, %v2206_v45  ;;  %v2593_v59 = vmul.f32 %v1223_v0, %v2223_v9  ;;  %v2960_v57 = vld [vmem:[#allocation54_spill] sm:$0xff] }
 0x250   :  { %2899 = vst [vmem:[#allocation61_spill] sm:$0xff] %v2567_v26  ;;  %2900 = vst [vmem:[#allocation63_spill] sm:$0xff] %v2569_v33  ;;  %v2596_v61 = vmul.f32 %v1223_v0, %v2242_v50  ;;  %v2599_v42 = vmul.f32 %v1223_v0, %v2259_v23  ;;  %v2602_v1 = vmul.f32 %v1223_v0, %v2276_v8  ;;  %v2958_v33 = vld [vmem:[#allocation51_spill] sm:$0xff]  ;;  %v2959_v26 = vld [vmem:[#allocation53_spill] sm:$0xff] }
 0x251   :  { %2901 = vst [vmem:[#allocation64_spill] sm:$0xff] %v2571_v52  ;;  %2902 = vst [vmem:[#allocation12_spill] sm:$0xff] %v2573_v4  ;;  %v2605_v63 = vmul.f32 %v1223_v0, %v2293_v10  ;;  %v2608_v16 = vmul.f32 %v1223_v0, %v2312_v49  ;;  %v2611_v45 = vmul.f32 %v1223_v0, %v2329_v2  ;;  %v2956_v4 = vld [vmem:[#allocation48_spill] sm:$0xff]  ;;  %v2957_v52 = vld [vmem:[#allocation50_spill] sm:$0xff] }
 0x252   :  { %2903 = vst [vmem:[#allocation66_spill] sm:$0xff] %v2575_v40  ;;  %2904 = vst [vmem:[#allocation67_spill] sm:$0xff] %v2578_v17  ;;  %v2614_v9 = vmul.f32 %v1223_v0, %v2346_v5  ;;  %v2617_v50 = vmul.f32 %v1223_v0, %v2363_v11  ;;  %v2620_v23 = vmul.f32 %v1223_v0, %v2380_v15  ;;  %v2923_v5 = vld [vmem:[#allocation13_spill] sm:$0xff]  ;;  %v2926_v15 = vld [vmem:[#allocation16_spill] sm:$0xff] }
 0x253   :  { %2905 = vst [vmem:[#allocation68_spill] sm:$0xff] %v2581_v18  ;;  %2906 = vst [vmem:[#allocation69_spill] sm:$0xff] %v2584_v39  ;;  %v2623_v8 = vmul.f32 %v1223_v0, %v2393_v51  ;;  %v2626_v10 = vmul.f32 %v1223_v0, %v2404_v54  ;;  %v2629_v49 = vmul.f32 %v1223_v0, %v2415_v53  ;;  %v2929_v54 = vld [vmem:[#allocation19_spill] sm:$0xff]  ;;  %v2952_v39 = vld [vmem:[#allocation42_spill] sm:$0xff] }
 0x254   :  { %2907 = vst [vmem:[#allocation70_spill] sm:$0xff] %v2587_v58  ;;  %2908 = vst [vmem:[#allocation71_spill] sm:$0xff] %v2590_v6  ;;  %v2632_v2 = vmul.f32 %v1223_v0, %v2426_v14  ;;  %v1310_v37 = vmul.f32 %v1308_v7, %v2923_v5  ;;  %v1311_v11 = vmul.f32 %v1308_v7, %v2924_v19  ;;  %v2932_v14 = vld [vmem:[#allocation22_spill] sm:$0xff]  ;;  %v2935_v19 = vld [vmem:[#allocation25_spill] sm:$0xff] }
 0x255   :  { %2909 = vst [vmem:[#allocation72_spill] sm:$0xff] %v2593_v59  ;;  %2910 = vst [vmem:[#allocation73_spill] sm:$0xff] %v2596_v61  ;;  %v1312_v29 = vmul.f32 %v1308_v7, %v2925_v25  ;;  %v1313_v28 = vmul.f32 %v1308_v7, %v2926_v15  ;;  %v1314_v51 = vmul.f32 %v1308_v7, %v2927_v60  ;;  %v2948_v61 = vld [vmem:[#allocation38_spill] sm:$0xff]  ;;  %v2949_v59 = vld [vmem:[#allocation39_spill] sm:$0xff] }
 0x256   :  { %2911 = vst [vmem:[#allocation74_spill] sm:$0xff] %v2599_v42  ;;  %2912 = vst [vmem:[#allocation75_spill] sm:$0xff] %v2602_v1  ;;  %v1315_v43 = vmul.f32 %v1308_v7, %v2928_v47  ;;  %v1316_v22 = vmul.f32 %v1308_v7, %v2929_v54  ;;  %v1317_v53 = vmul.f32 %v1308_v7, %v2930_v36  ;;  %v2946_v1 = vld [vmem:[#allocation36_spill] sm:$0xff]  ;;  %v2947_v42 = vld [vmem:[#allocation37_spill] sm:$0xff] }
 0x257   :  { %2913 = vst [vmem:[#allocation76_spill] sm:$0xff] %v2605_v63  ;;  %2914 = vst [vmem:[#allocation77_spill] sm:$0xff] %v2608_v16  ;;  %v1318_v38 = vmul.f32 %v1308_v7, %v2931_v35  ;;  %v1319_v0 = vmul.f32 %v1308_v7, %v2932_v14  ;;  %v1320_v55 = vmul.f32 %v1308_v7, %v2933_v20  ;;  %v2944_v16 = vld [vmem:[#allocation34_spill] sm:$0xff]  ;;  %v2945_v63 = vld [vmem:[#allocation35_spill] sm:$0xff] }
 0x258   :  { %2915 = vst [vmem:[#allocation78_spill] sm:$0xff] %v2611_v45  ;;  %2916 = vst [vmem:[#allocation79_spill] sm:$0xff] %v2614_v9  ;;  %v1321_v5 = vmul.f32 %v1308_v7, %v2934_v44  ;;  %v1322_v25 = vmul.f32 %v1308_v7, %v2935_v19  ;;  %v2942_v9 = vld [vmem:[#allocation32_spill] sm:$0xff]  ;;  %v2943_v45 = vld [vmem:[#allocation33_spill] sm:$0xff]  ;;  %v1331_v44 = vmul.f32 %v1308_v7, %v2944_v16 }
 0x259   :  { %2917 = vst [vmem:[#allocation80_spill] sm:$0xff] %v2617_v50  ;;  %2918 = vst [vmem:[#allocation81_spill] sm:$0xff] %v2620_v23  ;;  %v2940_v23 = vld [vmem:[#allocation30_spill] sm:$0xff]  ;;  %v2941_v50 = vld [vmem:[#allocation31_spill] sm:$0xff]  ;;  %v1329_v14 = vmul.f32 %v1308_v7, %v2942_v9  ;;  %v1330_v20 = vmul.f32 %v1308_v7, %v2943_v45  ;;  %v1332_v19 = vmul.f32 %v1308_v7, %v2945_v63 }
 0x25a   :  { %2919 = vst [vmem:[#allocation82_spill] sm:$0xff] %v2623_v8  ;;  %2920 = vst [vmem:[#allocation83_spill] sm:$0xff] %v2626_v10  ;;  %v2938_v10 = vld [vmem:[#allocation28_spill] sm:$0xff]  ;;  %v2939_v8 = vld [vmem:[#allocation29_spill] sm:$0xff]  ;;  %v1327_v36 = vmul.f32 %v1308_v7, %v2940_v23  ;;  %v1328_v35 = vmul.f32 %v1308_v7, %v2941_v50  ;;  %v1339_v9 = vmul.f32 %v1308_v7, %v2952_v39 }
 0x25b   :  { %2921 = vst [vmem:[#allocation84_spill] sm:$0xff] %v2629_v49  ;;  %2922 = vst [vmem:[#allocation85_spill] sm:$0xff] %v2632_v2  ;;  %v2936_v2 = vld [vmem:[#allocation26_spill] sm:$0xff]  ;;  %v2937_v49 = vld [vmem:[#allocation27_spill] sm:$0xff]  ;;  %v1325_v47 = vmul.f32 %v1308_v7, %v2938_v10  ;;  %v1326_v54 = vmul.f32 %v1308_v7, %v2939_v8  ;;  %v1335_v10 = vmul.f32 %v1308_v7, %v2948_v61 }
 0x25c   :  { %v1323_v15 = vmul.f32 %v1308_v7, %v2936_v2  ;;  %v1324_v60 = vmul.f32 %v1308_v7, %v2937_v49  ;;  %v1333_v2 = vmul.f32 %v1308_v7, %v2946_v1  ;;  %v1334_v49 = vmul.f32 %v1308_v7, %v2947_v42  ;;  %v2950_v6 = vld [vmem:[#allocation40_spill] sm:$0xff]  ;;  %v2951_v58 = vld [vmem:[#allocation41_spill] sm:$0xff]  ;;  %v2955_v40 = vld [vmem:[#allocation47_spill] sm:$0xff] }
 0x25d   :  { %v1336_v8 = vmul.f32 %v1308_v7, %v2949_v59  ;;  %v1337_v23 = vmul.f32 %v1308_v7, %v2950_v6  ;;  %v1338_v50 = vmul.f32 %v1308_v7, %v2951_v58  ;;  %v2953_v18 = vld [vmem:[#allocation44_spill] sm:$0xff]  ;;  %v2954_v17 = vld [vmem:[#allocation45_spill] sm:$0xff]  ;;  %v1342_v63 = vmul.f32 %v1308_v7, %v2955_v40  ;;  %v2961_v48 = vld [vmem:[#allocation58_spill] sm:$0xff] }
 0x25e   :  { %v1340_v45 = vmul.f32 %v1308_v7, %v2953_v18  ;;  %v1341_v16 = vmul.f32 %v1308_v7, %v2954_v17  ;;  %v1343_v1 = vmul.f32 %v1308_v7, %v2956_v4  ;;  %v1344_v42 = vmul.f32 %v1308_v7, %v2957_v52 }
 0x25f   :  { %v1345_v61 = vmul.f32 %v1308_v7, %v2958_v33  ;;  %v1346_v59 = vmul.f32 %v1308_v7, %v2959_v26  ;;  %v1347_v6 = vmul.f32 %v1308_v7, %v2960_v57  ;;  %v1348_v58 = vmul.f32 %v1308_v7, %v2961_v48 }
 0x260   :  { %v1349_v39 = vmul.f32 %v1308_v7, %v2962_v3  ;;  %v1390_v31 = vcombine.low %v1310_v37, %v1311_v11  ;;  %v1391_v18 = vcombine.low %v1312_v29, %v1313_v28  ;;  %v1392_v56 = vcombine.low %v1314_v51, %v1315_v43 }
 0x261   :  { %v1393_v17 = vcombine.low %v1316_v22, %v1317_v53  ;;  %v1394_v34 = vcombine.low %v1318_v38, %v1319_v0  ;;  %v1395_v40 = vcombine.low %v1320_v55, %v1321_v5  ;;  %v1396_v12 = vcombine.low %v1322_v25, %v1323_v15  ;;  %v2963_v38 = vld [vmem:[#allocation56_spill] sm:$0xff]  ;;  %v2964_v55 = vld [vmem:[#allocation43_spill] sm:$0xff]  ;;  %v2965_v25 = vld [vmem:[#allocation62_spill] sm:$0xff] }
 0x262   :  { %v1397_v4 = vcombine.low %v1324_v60, %v1325_v47  ;;  %v1398_v41 = vcombine.low %v1326_v54, %v1327_v36  ;;  %v1399_v52 = vcombine.low %v1328_v35, %v1329_v14  ;;  %v1400_v30 = vcombine.low %v1330_v20, %v1331_v44  ;;  %v2966_v60 = vld [vmem:[#allocation46_spill] sm:$0xff]  ;;  %v2967_v54 = vld [vmem:[#allocation65_spill] sm:$0xff]  ;;  %v2971_v35 = vld [vmem:[#allocation55_spill] sm:$0xff] }
 0x263   :  { %v1401_v33 = vcombine.low %v1332_v19, %v1333_v2  ;;  %v2674_v27 = vcombine.low %v1334_v49, %v1335_v10  ;;  %v2676_v26 = vcombine.low %v1336_v8, %v1337_v23  ;;  %v2678_v57 = vcombine.low %v1338_v50, %v1339_v9  ;;  %v2968_v36 = vld [vmem:[#allocation49_spill] sm:$0xff]  ;;  %v2972_v20 = vld [vmem:[#allocation60_spill] sm:$0xff]  ;;  %v2974_v49 = vld [vmem:[#allocation63_spill] sm:$0xff] }
 0x264   :  { %v2680_v48 = vcombine.low %v1340_v45, %v1341_v16  ;;  %v2682_v3 = vcombine.low %v1342_v63, %v1343_v1  ;;  %v2684_v7 = vcombine.low %v1344_v42, %v1345_v61  ;;  %v2686_v37 = vcombine.low %v1346_v59, %v1347_v6  ;;  %v2973_v19 = vld [vmem:[#allocation61_spill] sm:$0xff]  ;;  %v2975_v8 = vld [vmem:[#allocation64_spill] sm:$0xff]  ;;  %v2977_v45 = vld [vmem:[#allocation66_spill] sm:$0xff] }
 0x265   :  { %v2688_v11 = vcombine.low %v1348_v58, %v1349_v39  ;;  %v1430_v29 = vadd.f32 %v1390_v31, %v2535_v21  ;;  %v1431_v28 = vadd.f32 %v1391_v18, %v2537_v62  ;;  %v1432_v51 = vadd.f32 %v1392_v56, %v2539_v46  ;;  %v2969_v46 = vld [vmem:[#allocation52_spill] sm:$0xff]  ;;  %v2978_v63 = vld [vmem:[#allocation67_spill] sm:$0xff]  ;;  %v2980_v59 = vld [vmem:[#allocation69_spill] sm:$0xff] }
 0x266   :  { %v1433_v43 = vadd.f32 %v1393_v17, %v2541_v32  ;;  %v1434_v22 = vadd.f32 %v1394_v34, %v2543_v24  ;;  %v1435_v53 = vadd.f32 %v1395_v40, %v2545_v13  ;;  %v1436_v0 = vadd.f32 %v1396_v12, %v2963_v38  ;;  %v2970_v24 = vld [vmem:[#allocation57_spill] sm:$0xff]  ;;  %v2976_v50 = vld [vmem:[#allocation12_spill] sm:$0xff]  ;;  %v2981_v58 = vld [vmem:[#allocation70_spill] sm:$0xff] }
 0x267   :  { %v1437_v5 = vadd.f32 %v1397_v4, %v2964_v55  ;;  %v1438_v15 = vadd.f32 %v1398_v41, %v2965_v25  ;;  %v1439_v47 = vadd.f32 %v1399_v52, %v2966_v60  ;;  %v1440_v21 = vadd.f32 %v1400_v30, %v2967_v54  ;;  %1470 = vst [vmem:[#allocation8] sm:$0xff] %v1430_v29  ;;  %v2979_v42 = vld [vmem:[#allocation68_spill] sm:$0xff]  ;;  %v2982_v29 = vld [vmem:[#allocation71_spill] sm:$0xff]  ;;  %v2988_v55 = vld [vmem:[#allocation77_spill] sm:$0xff] }
 0x268   :  { %v1441_v62 = vadd.f32 %v1401_v33, %v2968_v36  ;;  %1471 = vst [vmem:[#allocation8 + $0x8] sm:$0xff] %v1431_v28  ;;  %1472 = vst [vmem:[#allocation8 + $0x10] sm:$0xff] %v1432_v51  ;;  %v1442_v32 = vadd.f32 %v2674_v27, %v2969_v46  ;;  %v1443_v13 = vadd.f32 %v2676_v26, %v2970_v24  ;;  %v2983_v51 = vld [vmem:[#allocation72_spill] sm:$0xff]  ;;  %v2994_v60 = vld [vmem:[#allocation83_spill] sm:$0xff] }
 0x269   :  { %1473 = vst [vmem:[#allocation8 + $0x18] sm:$0xff] %v1433_v43  ;;  %v1444_v14 = vadd.f32 %v2678_v57, %v2971_v35  ;;  %v1445_v44 = vadd.f32 %v2680_v48, %v2972_v20  ;;  %1474 = vst [vmem:[#allocation8 + $0x20] sm:$0xff] %v1434_v22  ;;  %v1446_v2 = vadd.f32 %v2682_v3, %v2973_v19  ;;  %v2984_v22 = vld [vmem:[#allocation73_spill] sm:$0xff]  ;;  %v2987_v38 = vld [vmem:[#allocation76_spill] sm:$0xff] }
 0x26a   :  { %1475 = vst [vmem:[#allocation8 + $0x28] sm:$0xff] %v1435_v53  ;;  %1476 = vst [vmem:[#allocation8 + $0x30] sm:$0xff] %v1436_v0  ;;  %v1447_v10 = vadd.f32 %v2684_v7, %v2974_v49  ;;  %v1448_v23 = vadd.f32 %v2686_v37, %v2975_v8  ;;  %v1449_v9 = vadd.f32 %v2688_v11, %v2976_v50  ;;  %v2991_v25 = vld [vmem:[#allocation80_spill] sm:$0xff] }
 0x26b   :  { %1477 = vst [vmem:[#allocation8 + $0x38] sm:$0xff] %v1437_v5  ;;  %1478 = vst [vmem:[#allocation8 + $0x40] sm:$0xff] %v1438_v15  ;;  %v1450_v16 = vadd.f32 %v1390_v31, %v2977_v45  ;;  %v1451_v1 = vadd.f32 %v1391_v18, %v2978_v63  ;;  %v1452_v61 = vadd.f32 %v1392_v56, %v2979_v42  ;;  %v2985_v56 = vld [vmem:[#allocation74_spill] sm:$0xff]  ;;  %v2986_v18 = vld [vmem:[#allocation75_spill] sm:$0xff] }
 0x26c   :  { %1479 = vst [vmem:[#allocation8 + $0x48] sm:$0xff] %v1439_v47  ;;  %1480 = vst [vmem:[#allocation8 + $0x50] sm:$0xff] %v1440_v21  ;;  %v1453_v6 = vadd.f32 %v1393_v17, %v2980_v59  ;;  %v1454_v39 = vadd.f32 %v1394_v34, %v2981_v58  ;;  %v1455_v28 = vadd.f32 %v1395_v40, %v2982_v29 }
 0x26d   :  { %1481 = vst [vmem:[#allocation8 + $0x58] sm:$0xff] %v1441_v62  ;;  %1482 = vst [vmem:[#allocation8 + $0x60] sm:$0xff] %v1442_v32  ;;  %v1456_v43 = vadd.f32 %v1396_v12, %v2983_v51  ;;  %v1457_v53 = vadd.f32 %v1397_v4, %v2984_v22  ;;  %v1458_v31 = vadd.f32 %v1398_v41, %v2985_v56  ;;  %v2989_v12 = vld [vmem:[#allocation78_spill] sm:$0xff]  ;;  %v2990_v4 = vld [vmem:[#allocation79_spill] sm:$0xff] }
 0x26e   :  { %1483 = vst [vmem:[#allocation8 + $0x68] sm:$0xff] %v1443_v13  ;;  %1484 = vst [vmem:[#allocation8 + $0x70] sm:$0xff] %v1444_v14  ;;  %v1459_v17 = vadd.f32 %v1399_v52, %v2986_v18  ;;  %v1460_v0 = vadd.f32 %v1400_v30, %v2987_v38  ;;  %v1461_v34 = vadd.f32 %v1401_v33, %v2988_v55  ;;  %v2992_v41 = vld [vmem:[#allocation81_spill] sm:$0xff]  ;;  %v2993_v30 = vld [vmem:[#allocation82_spill] sm:$0xff] }
 0x26f   :  { %1485 = vst [vmem:[#allocation8 + $0x78] sm:$0xff] %v1445_v44  ;;  %1486 = vst [vmem:[#allocation8 + $0x80] sm:$0xff] %v1446_v2  ;;  %v1462_v40 = vadd.f32 %v2674_v27, %v2989_v12  ;;  %v1463_v5 = vadd.f32 %v2676_v26, %v2990_v4  ;;  %v1464_v15 = vadd.f32 %v2678_v57, %v2991_v25  ;;  %v2995_v27 = vld [vmem:[#allocation84_spill] sm:$0xff]  ;;  %v2996_v26 = vld [vmem:[#allocation85_spill] sm:$0xff] }
 0x270   :  { %1487 = vst [vmem:[#allocation8 + $0x88] sm:$0xff] %v1447_v10  ;;  %1488 = vst [vmem:[#allocation8 + $0x90] sm:$0xff] %v1448_v23  ;;  %v1465_v52 = vadd.f32 %v2680_v48, %v2992_v41  ;;  %v1466_v33 = vadd.f32 %v2682_v3, %v2993_v30  ;;  %v1467_v47 = vadd.f32 %v2684_v7, %v2994_v60 }
 0x271   :  { %1489 = vst [vmem:[#allocation8 + $0x98] sm:$0xff] %v1449_v9  ;;  %1490 = vst [vmem:[#allocation8 + $0xa0] sm:$0xff] %v1450_v16  ;;  %v1468_v54 = vadd.f32 %v2686_v37, %v2995_v27  ;;  %v1469_v21 = vadd.f32 %v2688_v11, %v2996_v26 }
 0x272   :  { %1491 = vst [vmem:[#allocation8 + $0xa8] sm:$0xff] %v1451_v1  ;;  %1492 = vst [vmem:[#allocation8 + $0xb0] sm:$0xff] %v1452_v61 }
 0x273   :  { %1493 = vst [vmem:[#allocation8 + $0xb8] sm:$0xff] %v1453_v6  ;;  %1494 = vst [vmem:[#allocation8 + $0xc0] sm:$0xff] %v1454_v39 }
 0x274   :  { %1495 = vst [vmem:[#allocation8 + $0xc8] sm:$0xff] %v1455_v28  ;;  %1496 = vst [vmem:[#allocation8 + $0xd0] sm:$0xff] %v1456_v43 }
 0x275   :  { %1497 = vst [vmem:[#allocation8 + $0xd8] sm:$0xff] %v1457_v53  ;;  %1498 = vst [vmem:[#allocation8 + $0xe0] sm:$0xff] %v1458_v31 }
 0x276   :  { %1499 = vst [vmem:[#allocation8 + $0xe8] sm:$0xff] %v1459_v17  ;;  %1500 = vst [vmem:[#allocation8 + $0xf0] sm:$0xff] %v1460_v0 }
 0x277   :  { %1501 = vst [vmem:[#allocation8 + $0xf8] sm:$0xff] %v1461_v34  ;;  %1502 = vst [vmem:[#allocation8 + $0x100] sm:$0xff] %v1462_v40 }
 0x278   :  { %1503 = vst [vmem:[#allocation8 + $0x108] sm:$0xff] %v1463_v5  ;;  %1504 = vst [vmem:[#allocation8 + $0x110] sm:$0xff] %v1464_v15 }
 0x279   :  { %1505 = vst [vmem:[#allocation8 + $0x118] sm:$0xff] %v1465_v52  ;;  %1506 = vst [vmem:[#allocation8 + $0x120] sm:$0xff] %v1466_v33 }
 0x27a   :  { %1507 = vst [vmem:[#allocation8 + $0x128] sm:$0xff] %v1467_v47  ;;  %1508 = vst [vmem:[#allocation8 + $0x130] sm:$0xff] %v1468_v54 }
 0x27b   :  { %1509 = vst [vmem:[#allocation8 + $0x138] sm:$0xff] %v1469_v21 }
 0x27c   :  { %1638 = shalt.err (!%p1635_p0)
}
 0x27d   :  { %s1639_s10 = scalar_lea.hbm %s2766_s5, 5120 }
 0x27e   :  { %p1640_p1 = scmp.ne.s32.totalorder %s2766_s5, %s1639_s10  ;;  %p1643_p2 = scmp.lt.u32.totalorder %s1639_s10, %s2766_s5 }
 0x280   :  { %p1645_p3 = pnand %p1643_p2, %p1640_p1 }
 0x282   :  { %1648 = shalt.err (!%p1645_p3)
}
 0x283   :  { %1521 = dma.vmem_to_hbm [thread:$0]  %s1516_s3, 5120, %s2766_s5, [#allocation4], %s1658_s0, %s1658_s0, %s1659_s21  }
 0x284   :  { %1653 = dma.done.wait [#allocation4], 5120  }
 0x285   :  { %1654 = vsyncadd [#allocation4], 4294962176 }
 0x286   :  { %1525 = vsyncpa [#allocation3], 1 }
 0x287   :  { %1526 = vsyncpa [#allocation6], 1 }
 0x288   :  { %1527 = vsyncpa [#allocation4], 1 }

</bundles_post_ra>
